<compile_context>
chip_gen: v6e
topology: v6e:2x2x1
jax: 0.10.0
libtpu: 0.0.40
codegen_flags: <defaults>
</compile_context>

<pallas_src>
import jax
import jax.numpy as jnp
from jax.experimental import pallas as pl
from jax.experimental.pallas import tpu as pltpu


# ----------------------------- fused encoder kernel -------------------------

def _encoder_kernel(emb_f_ref, emb_b_ref,
                    wx_f_ref, wh_f_ref, b_f_ref,
                    wx_b_ref, wh_b_ref, b_b_ref,
                    ctx_f_ref, ctx_b_ref, hf_ref, cf_ref, hb_ref, cb_ref,
                    hf_s, cf_s, hb_s, cb_s):
    """One grid step == one timestep of BOTH encoder directions.

    Gate order follows PyTorch: i, f, g, o (per-gate weight slabs (4, in, H))."""
    t = pl.program_id(0)
    last = pl.num_programs(0) - 1

    @pl.when(t == 0)
    def _():
        for s in (hf_s, cf_s, hb_s, cb_s):
            s[...] = jnp.zeros_like(s)

    def cell(x, h, c, wx_ref, wh_ref, b_ref):
        def gate(g):
            wx = wx_ref[g]
            wh = wh_ref[g]
            return (jnp.dot(x.astype(wx.dtype), wx,
                            preferred_element_type=jnp.float32)
                    + jnp.dot(h.astype(wh.dtype), wh,
                              preferred_element_type=jnp.float32)
                    + b_ref[g])
        i = jax.nn.sigmoid(gate(0))
        f = jax.nn.sigmoid(gate(1))
        g_ = jnp.tanh(gate(2))
        o = jax.nn.sigmoid(gate(3))
        c_new = f * c + i * g_
        h_new = o * jnp.tanh(c_new)
        return h_new, c_new

    # forward direction: position t
    hf, cf = cell(emb_f_ref[0], hf_s[...], cf_s[...], wx_f_ref, wh_f_ref, b_f_ref)
    hf_s[...] = hf
    cf_s[...] = cf
    ctx_f_ref[0] = hf.astype(ctx_f_ref.dtype)

    # backward direction: position S-1-t (block index handled by index_map)
    hb, cb = cell(emb_b_ref[0], hb_s[...], cb_s[...], wx_b_ref, wh_b_ref, b_b_ref)
    hb_s[...] = hb
    cb_s[...] = cb
    ctx_b_ref[0] = hb.astype(ctx_b_ref.dtype)

    @pl.when(t == last)
    def _():
        hf_ref[...] = hf
        cf_ref[...] = cf
        hb_ref[...] = hb
        cb_ref[...] = cb


def encoder_forward(params, emb):
    S, B, E = emb.shape
    Hd = params['enc_wh_f'].shape[-1]

    def const3(shape):
        return pl.BlockSpec(shape, lambda t: (0, 0, 0))

    def const2(shape):
        return pl.BlockSpec(shape, lambda t: (0, 0))

    return pl.pallas_call(
        _encoder_kernel,
        grid=(S,),
        in_specs=[
            pl.BlockSpec((1, B, E), lambda t: (t, 0, 0)),            # emb fwd
            pl.BlockSpec((1, B, E), lambda t: (S - 1 - t, 0, 0)),    # emb bwd
            const3((4, E, Hd)), const3((4, Hd, Hd)), const3((4, 1, Hd)),
            const3((4, E, Hd)), const3((4, Hd, Hd)), const3((4, 1, Hd)),
        ],
        out_specs=(
            pl.BlockSpec((1, B, Hd), lambda t: (t, 0, 0)),           # ctx fwd
            pl.BlockSpec((1, B, Hd), lambda t: (S - 1 - t, 0, 0)),   # ctx bwd
            const2((B, Hd)), const2((B, Hd)), const2((B, Hd)), const2((B, Hd)),
        ),
        out_shape=(
            jax.ShapeDtypeStruct((S, B, Hd), jnp.bfloat16),
            jax.ShapeDtypeStruct((S, B, Hd), jnp.bfloat16),
            jax.ShapeDtypeStruct((B, Hd), jnp.float32),
            jax.ShapeDtypeStruct((B, Hd), jnp.float32),
            jax.ShapeDtypeStruct((B, Hd), jnp.float32),
            jax.ShapeDtypeStruct((B, Hd), jnp.float32),
        ),
        scratch_shapes=[pltpu.VMEM((B, Hd), jnp.float32)] * 4,
        compiler_params=pltpu.CompilerParams(
            dimension_semantics=("arbitrary",)),
    )(emb, emb,
      params['enc_wx_f'], params['enc_wh_f'], params['enc_b_f'],
      params['enc_wx_b'], params['enc_wh_b'], params['enc_b_b'])


# ------------------- fused decoder (LSTM + attention) kernel -----------------

def _decoder_kernel(emb_ref, ctx_ref, h0_ref, c0_ref,
                    wx_ref, wf_ref, wh_ref, b_ref,
                    w_in_ref, w_oc_ref, w_od_ref,
                    out_ref, attn_ref,
                    h_s, c_s, feed_s):
    t = pl.program_id(0)
    last = pl.num_programs(0) - 1

    @pl.when(t == 0)
    def _():
        h_s[...] = h0_ref[...]
        c_s[...] = c0_ref[...]
        feed_s[...] = jnp.zeros_like(feed_s)

    x = emb_ref[0]          # (B, E) bf16
    h = h_s[...]            # (B, H) f32
    feed = feed_s[...]      # (B, H) f32 — input-feed (previous attention output)

    # input-feed concat realized as two matmuls: [emb ; feed] @ W == emb@Wx + feed@Wf
    def gate(g):
        wx = wx_ref[g]
        wf = wf_ref[g]
        wh = wh_ref[g]
        return (jnp.dot(x.astype(wx.dtype), wx, preferred_element_type=jnp.float32)
                + jnp.dot(feed.astype(wf.dtype), wf, preferred_element_type=jnp.float32)
                + jnp.dot(h.astype(wh.dtype), wh, preferred_element_type=jnp.float32)
                + b_ref[g])

    i = jax.nn.sigmoid(gate(0))
    f = jax.nn.sigmoid(gate(1))
    g_ = jnp.tanh(gate(2))
    o = jax.nn.sigmoid(gate(3))
    c_new = f * c_s[...] + i * g_
    h_new = o * jnp.tanh(c_new)
    c_s[...] = c_new
    h_s[...] = h_new

    # ---- Luong 'general' global attention: MXU contractions over H ----------
    ctx = ctx_ref[...]                                      # (B, S, H) bf16
    w_in = w_in_ref[...]
    target = jnp.dot(h_new.astype(w_in.dtype), w_in,
                     preferred_element_type=jnp.float32)    # (B, H)
    q = target.astype(ctx.dtype)[:, None, :]                # (B, 1, H)
    scores = jnp.einsum('bqh,bsh->bqs', q, ctx,
                        preferred_element_type=jnp.float32)  # (B, 1, S)
    scores = scores - jnp.max(scores, axis=-1, keepdims=True)
    e = jnp.exp(scores)
    align = e * pl.reciprocal(jnp.sum(e, axis=-1, keepdims=True), approx=True)
    weighted = jnp.einsum('bqs,bsh->bqh', align.astype(ctx.dtype), ctx,
                          preferred_element_type=jnp.float32)[:, 0, :]  # (B, H)

    # linear_out([weighted ; dec]) split into two matmuls, then tanh
    w_oc = w_oc_ref[...]
    w_od = w_od_ref[...]
    out = jnp.tanh(
        jnp.dot(weighted.astype(w_oc.dtype), w_oc, preferred_element_type=jnp.float32)
        + jnp.dot(h_new.astype(w_od.dtype), w_od, preferred_element_type=jnp.float32))

    feed_s[...] = out
    out_ref[0] = out.astype(out_ref.dtype)

    # Only the last step's attention is returned by the model.
    @pl.when(t == last)
    def _():
        attn_ref[...] = align[:, 0, :]


def decoder_forward(params, dec_emb, ctx_bsh, h0, c0):
    T, B, E = dec_emb.shape
    S = ctx_bsh.shape[1]
    H = h0.shape[-1]

    def const3(shape):
        return pl.BlockSpec(shape, lambda t: (0, 0, 0))

    def const2(shape):
        return pl.BlockSpec(shape, lambda t: (0, 0))

    return pl.pallas_call(
        _decoder_kernel,
        grid=(T,),
        in_specs=[
            pl.BlockSpec((1, B, E), lambda t: (t, 0, 0)),   # dec_emb[t]
            const3((B, S, H)),                              # context (resident)
            const2((B, H)), const2((B, H)),                 # h0, c0
            const3((4, E, H)), const3((4, H, H)),
            const3((4, H, H)), const3((4, 1, H)),
            const2((H, H)), const2((H, H)), const2((H, H)),
        ],
        out_specs=(
            pl.BlockSpec((1, B, H), lambda t: (t, 0, 0)),   # outputs[t]
            pl.BlockSpec((B, S), lambda t: (0, 0)),         # last-step attention
        ),
        out_shape=(
            jax.ShapeDtypeStruct((T, B, H), jnp.float32),
            jax.ShapeDtypeStruct((B, S), jnp.float32),
        ),
        scratch_shapes=[pltpu.VMEM((B, H), jnp.float32)] * 3,   # h, c, input-feed
        compiler_params=pltpu.CompilerParams(
            dimension_semantics=("arbitrary",)),
    )(dec_emb, ctx_bsh, h0, c0,
      params['dec_wx'], params['dec_wfeed'], params['dec_wh'], params['dec_b'],
      params['attn_w_in'], params['attn_w_out_c'], params['attn_w_out_d'])


# ------------------------------- parameters ---------------------------------

def init_params(key, src_vocab, tgt_vocab, word_vec, hidden):
    Hd = hidden // 2  # per-direction encoder hidden (num_directions == 2)
    wdt = jnp.bfloat16

    def u(k, shape, dtype=jnp.float32):
        return jax.random.uniform(k, shape, jnp.float32, -0.1, 0.1).astype(dtype)

    ks = jax.random.split(key, 15)
    return dict(
        enc_emb=u(ks[0], (src_vocab, word_vec), wdt),
        enc_wx_f=u(ks[1], (4, word_vec, Hd), wdt),      # per-gate: i, f, g, o
        enc_wh_f=u(ks[2], (4, Hd, Hd), wdt),
        enc_b_f=u(ks[3], (4, 1, Hd)),                   # b_ih + b_hh combined
        enc_wx_b=u(ks[4], (4, word_vec, Hd), wdt),
        enc_wh_b=u(ks[5], (4, Hd, Hd), wdt),
        enc_b_b=u(ks[6], (4, 1, Hd)),
        dec_emb=u(ks[7], (tgt_vocab, word_vec), wdt),
        dec_wx=u(ks[8], (4, word_vec, hidden), wdt),    # emb part of input-feed concat
        dec_wfeed=u(ks[9], (4, hidden, hidden), wdt),   # feed part of input-feed concat
        dec_wh=u(ks[10], (4, hidden, hidden), wdt),
        dec_b=u(ks[11], (4, 1, hidden)),
        attn_w_in=u(ks[12], (hidden, hidden), wdt),
        attn_w_out_c=u(ks[13], (hidden, hidden), wdt),  # acts on weighted context
        attn_w_out_d=u(ks[14], (hidden, hidden), wdt),  # acts on decoder state
    )


# ------------------------------ forward ('xe') -------------------------------

def nmt_forward_xe(params, src, tgt_full, hidden):
    """Equivalent of NMTModel.forward(input, mode='xe') -> (outputs, _attn)."""
    del hidden  # shapes are derived from params
    tgt = tgt_full[:-1]                 # tgt = input[1][:-1]

    # TODO(synk): embedding gathers stay in plain JAX; at production vocab /
    # word_vec sizes stream rows into the kernels via scalar prefetch instead.
    enc_emb = params['enc_emb'][src]    # (S, B, E) bf16
    dec_emb = params['dec_emb'][tgt]    # (T, B, E) bf16

    # ---- encoder: one fused bidirectional recurrence ----
    ctx_f, ctx_b, hf, cf, hb, cb = encoder_forward(params, enc_emb)

    # bidirectional context, batch-major (B, S, hidden) for attention, bf16
    ctx_bsh = jnp.transpose(jnp.concatenate([ctx_f, ctx_b], axis=-1), (1, 0, 2))

    # _fix_enc_hidden: (2, B, Hd) -> (B, 2*Hd) == concat of directions
    h0 = jnp.concatenate([hf, hb], axis=-1)
    c0 = jnp.concatenate([cf, cb], axis=-1)

    # ---- decoder: one fused input-feeding LSTM + attention recurrence ----
    # make_init_decoder_output (zeros) is the feed_s scratch init inside the kernel.
    # TODO(synk): decoder dropout skipped (eval-mode identity); no source-length
    #             attention mask (toy fixed-length batch).
    outputs, attn = decoder_forward(params, dec_emb, ctx_bsh, h0, c0)
    return outputs, attn


# ---------------------------------- main -------------------------------------

if __name__ == "__main__":
    key = jax.random.PRNGKey(0)
    src_vocab, tgt_vocab = 20, 20
    word_vec, hidden = 32, 32
    S, T_full, B = 8, 7, 2

    pkey, skey, tkey = jax.random.split(key, 3)
    params = init_params(pkey, src_vocab, tgt_vocab, word_vec, hidden)
    src = jax.random.randint(skey, (S, B), 0, src_vocab, dtype=jnp.int32)
    tgt = jax.random.randint(tkey, (T_full, B), 0, tgt_vocab, dtype=jnp.int32)

    fwd = jax.jit(nmt_forward_xe, static_argnums=(3,))
    outputs, attn = fwd(params, src, tgt, hidden)
    jax.block_until_ready((outputs, attn))

    assert outputs.shape == (T_full - 1, B, hidden)
    assert attn.shape == (B, S)
    print("KERNEL_OK")
</pallas_src>

<mosaic_0001>
module attributes {stable_mosaic.version = 11 : i64} {
  func.func @_encoder_kernel(%arg0: i32, %arg1: memref<1x2x32xbf16, #tpu.memory_space<vmem>>, %arg2: memref<1x2x32xbf16, #tpu.memory_space<vmem>>, %arg3: memref<4x32x16xbf16, #tpu.memory_space<vmem>>, %arg4: memref<4x16x16xbf16, #tpu.memory_space<vmem>>, %arg5: memref<4x1x16xf32, #tpu.memory_space<vmem>>, %arg6: memref<4x32x16xbf16, #tpu.memory_space<vmem>>, %arg7: memref<4x16x16xbf16, #tpu.memory_space<vmem>>, %arg8: memref<4x1x16xf32, #tpu.memory_space<vmem>>, %arg9: memref<1x2x16xbf16, #tpu.memory_space<vmem>>, %arg10: memref<1x2x16xbf16, #tpu.memory_space<vmem>>, %arg11: memref<2x16xf32, #tpu.memory_space<vmem>>, %arg12: memref<2x16xf32, #tpu.memory_space<vmem>>, %arg13: memref<2x16xf32, #tpu.memory_space<vmem>>, %arg14: memref<2x16xf32, #tpu.memory_space<vmem>>, %arg15: memref<2x16xf32, #tpu.memory_space<vmem>>, %arg16: memref<2x16xf32, #tpu.memory_space<vmem>>, %arg17: memref<2x16xf32, #tpu.memory_space<vmem>>, %arg18: memref<2x16xf32, #tpu.memory_space<vmem>>) attributes {dimension_semantics = [#tpu.dimension_semantics<arbitrary>], iteration_bounds = array<i64: 8>, scalar_prefetch = 0 : i64, scratch_operands = 4 : i64, tpu.core_type = #tpu.core_type<tc>, window_params = [{transform_indices = @transform_0, window_bounds = array<i64: 1, 2, 32>}, {transform_indices = @transform_1, window_bounds = array<i64: 1, 2, 32>}, {pipeline_mode = #tpu.pipeline_mode<synchronous>, transform_indices = @transform_2, window_bounds = array<i64: 4, 32, 16>}, {pipeline_mode = #tpu.pipeline_mode<synchronous>, transform_indices = @transform_3, window_bounds = array<i64: 4, 16, 16>}, {pipeline_mode = #tpu.pipeline_mode<synchronous>, transform_indices = @transform_4, window_bounds = array<i64: 4, 1, 16>}, {pipeline_mode = #tpu.pipeline_mode<synchronous>, transform_indices = @transform_5, window_bounds = array<i64: 4, 32, 16>}, {pipeline_mode = #tpu.pipeline_mode<synchronous>, transform_indices = @transform_6, window_bounds = array<i64: 4, 16, 16>}, {pipeline_mode = #tpu.pipeline_mode<synchronous>, transform_indices = @transform_7, window_bounds = array<i64: 4, 1, 16>}, {transform_indices = @transform_8, window_bounds = array<i64: 1, 2, 16>}, {transform_indices = @transform_9, window_bounds = array<i64: 1, 2, 16>}, {pipeline_mode = #tpu.pipeline_mode<synchronous>, transform_indices = @transform_10, window_bounds = array<i64: 2, 16>}, {pipeline_mode = #tpu.pipeline_mode<synchronous>, transform_indices = @transform_11, window_bounds = array<i64: 2, 16>}, {pipeline_mode = #tpu.pipeline_mode<synchronous>, transform_indices = @transform_12, window_bounds = array<i64: 2, 16>}, {pipeline_mode = #tpu.pipeline_mode<synchronous>, transform_indices = @transform_13, window_bounds = array<i64: 2, 16>}]} {
    %c0_i32 = arith.constant 0 : i32
    %0 = arith.cmpi eq, %arg0, %c0_i32 : i32
    %1 = arith.extui %0 : i1 to i32
    %c0_i32_0 = arith.constant 0 : i32
    %2 = arith.cmpi ne, %1, %c0_i32_0 : i32
    scf.if %2 {
      %cst_119 = arith.constant 0.000000e+00 : f32
      %164 = vector.broadcast %cst_119 : f32 to vector<2x16xf32>
      %c0_120 = arith.constant 0 : index
      %c0_121 = arith.constant 0 : index
      %165 = vector.load %arg15[%c0_120, %c0_121] : memref<2x16xf32, #tpu.memory_space<vmem>>, vector<2x16xf32>
      tpu.vector_store %arg15[%c0_120, %c0_121], %164 {strides = array<i32>} : memref<2x16xf32, #tpu.memory_space<vmem>>, vector<2x16xf32>,
      %cst_122 = arith.constant 0.000000e+00 : f32
      %166 = vector.broadcast %cst_122 : f32 to vector<2x16xf32>
      %c0_123 = arith.constant 0 : index
      %c0_124 = arith.constant 0 : index
      %167 = vector.load %arg16[%c0_123, %c0_124] : memref<2x16xf32, #tpu.memory_space<vmem>>, vector<2x16xf32>
      tpu.vector_store %arg16[%c0_123, %c0_124], %166 {strides = array<i32>} : memref<2x16xf32, #tpu.memory_space<vmem>>, vector<2x16xf32>,
      %cst_125 = arith.constant 0.000000e+00 : f32
      %168 = vector.broadcast %cst_125 : f32 to vector<2x16xf32>
      %c0_126 = arith.constant 0 : index
      %c0_127 = arith.constant 0 : index
      %169 = vector.load %arg17[%c0_126, %c0_127] : memref<2x16xf32, #tpu.memory_space<vmem>>, vector<2x16xf32>
      tpu.vector_store %arg17[%c0_126, %c0_127], %168 {strides = array<i32>} : memref<2x16xf32, #tpu.memory_space<vmem>>, vector<2x16xf32>,
      %cst_128 = arith.constant 0.000000e+00 : f32
      %170 = vector.broadcast %cst_128 : f32 to vector<2x16xf32>
      %c0_129 = arith.constant 0 : index
      %c0_130 = arith.constant 0 : index
      %171 = vector.load %arg18[%c0_129, %c0_130] : memref<2x16xf32, #tpu.memory_space<vmem>>, vector<2x16xf32>
      tpu.vector_store %arg18[%c0_129, %c0_130], %170 {strides = array<i32>} : memref<2x16xf32, #tpu.memory_space<vmem>>, vector<2x16xf32>,
    } else {
    }
    %c0 = arith.constant 0 : index
    %c0_1 = arith.constant 0 : index
    %c0_2 = arith.constant 0 : index
    %3 = vector.load %arg1[%c0, %c0_1, %c0_2] : memref<1x2x32xbf16, #tpu.memory_space<vmem>>, vector<1x2x32xbf16>
    %4 = vector.shape_cast %3 : vector<1x2x32xbf16> to vector<2x32xbf16>
    %c0_3 = arith.constant 0 : index
    %c0_4 = arith.constant 0 : index
    %5 = vector.load %arg15[%c0_3, %c0_4] : memref<2x16xf32, #tpu.memory_space<vmem>>, vector<2x16xf32>
    %c0_5 = arith.constant 0 : index
    %c0_6 = arith.constant 0 : index
    %6 = vector.load %arg16[%c0_5, %c0_6] : memref<2x16xf32, #tpu.memory_space<vmem>>, vector<2x16xf32>
    %c0_7 = arith.constant 0 : index
    %c0_8 = arith.constant 0 : index
    %c0_9 = arith.constant 0 : index
    %7 = vector.load %arg3[%c0_7, %c0_8, %c0_9] : memref<4x32x16xbf16, #tpu.memory_space<vmem>>, vector<1x32x16xbf16>
    %8 = vector.shape_cast %7 : vector<1x32x16xbf16> to vector<32x16xbf16>
    %c0_10 = arith.constant 0 : index
    %c0_11 = arith.constant 0 : index
    %c0_12 = arith.constant 0 : index
    %9 = vector.load %arg4[%c0_10, %c0_11, %c0_12] : memref<4x16x16xbf16, #tpu.memory_space<vmem>>, vector<1x16x16xbf16>
    %10 = vector.shape_cast %9 : vector<1x16x16xbf16> to vector<16x16xbf16>
    %cst = arith.constant dense<0.000000e+00> : vector<2x16xf32>
    %11 = tpu.matmul %4, %8, %cst {dimension_numbers = #tpu.dot_dimension_numbers<[1], [0], [0], [1], [0, 0, 1, 1], [], []>} : vector<2x32xbf16>, vector<32x16xbf16>, vector<2x16xf32> -> vector<2x16xf32>
    %12 = arith.truncf %5 : vector<2x16xf32> to vector<2x16xbf16>
    %cst_13 = arith.constant dense<0.000000e+00> : vector<2x16xf32>
    %13 = tpu.matmul %12, %10, %cst_13 {dimension_numbers = #tpu.dot_dimension_numbers<[1], [0], [0], [1], [0, 0, 1, 1], [], []>} : vector<2x16xbf16>, vector<16x16xbf16>, vector<2x16xf32> -> vector<2x16xf32>
    %14 = arith.addf %11, %13 : vector<2x16xf32>
    %c0_14 = arith.constant 0 : index
    %c0_15 = arith.constant 0 : index
    %c0_16 = arith.constant 0 : index
    %15 = vector.load %arg5[%c0_14, %c0_15, %c0_16] : memref<4x1x16xf32, #tpu.memory_space<vmem>>, vector<1x1x16xf32>
    %16 = vector.shape_cast %15 : vector<1x1x16xf32> to vector<1x16xf32>
    %17 = vector.broadcast %16 : vector<1x16xf32> to vector<2x16xf32>
    %18 = arith.addf %14, %17 : vector<2x16xf32>
    %19 = arith.negf %18 : vector<2x16xf32>
    %20 = math.exp %19 : vector<2x16xf32>
    %cst_17 = arith.constant 1.000000e+00 : f32
    %21 = vector.broadcast %cst_17 : f32 to vector<2x16xf32>
    %22 = arith.addf %21, %20 : vector<2x16xf32>
    %23 = arith.divf %21, %22 : vector<2x16xf32>
    %c1 = arith.constant 1 : index
    %c0_18 = arith.constant 0 : index
    %c0_19 = arith.constant 0 : index
    %24 = vector.load %arg3[%c1, %c0_18, %c0_19] : memref<4x32x16xbf16, #tpu.memory_space<vmem>>, vector<1x32x16xbf16>
    %25 = vector.shape_cast %24 : vector<1x32x16xbf16> to vector<32x16xbf16>
    %c1_20 = arith.constant 1 : index
    %c0_21 = arith.constant 0 : index
    %c0_22 = arith.constant 0 : index
    %26 = vector.load %arg4[%c1_20, %c0_21, %c0_22] : memref<4x16x16xbf16, #tpu.memory_space<vmem>>, vector<1x16x16xbf16>
    %27 = vector.shape_cast %26 : vector<1x16x16xbf16> to vector<16x16xbf16>
    %cst_23 = arith.constant dense<0.000000e+00> : vector<2x16xf32>
    %28 = tpu.matmul %4, %25, %cst_23 {dimension_numbers = #tpu.dot_dimension_numbers<[1], [0], [0], [1], [0, 0, 1, 1], [], []>} : vector<2x32xbf16>, vector<32x16xbf16>, vector<2x16xf32> -> vector<2x16xf32>
    %29 = arith.truncf %5 : vector<2x16xf32> to vector<2x16xbf16>
    %cst_24 = arith.constant dense<0.000000e+00> : vector<2x16xf32>
    %30 = tpu.matmul %29, %27, %cst_24 {dimension_numbers = #tpu.dot_dimension_numbers<[1], [0], [0], [1], [0, 0, 1, 1], [], []>} : vector<2x16xbf16>, vector<16x16xbf16>, vector<2x16xf32> -> vector<2x16xf32>
    %31 = arith.addf %28, %30 : vector<2x16xf32>
    %c1_25 = arith.constant 1 : index
    %c0_26 = arith.constant 0 : index
    %c0_27 = arith.constant 0 : index
    %32 = vector.load %arg5[%c1_25, %c0_26, %c0_27] : memref<4x1x16xf32, #tpu.memory_space<vmem>>, vector<1x1x16xf32>
    %33 = vector.shape_cast %32 : vector<1x1x16xf32> to vector<1x16xf32>
    %34 = vector.broadcast %33 : vector<1x16xf32> to vector<2x16xf32>
    %35 = arith.addf %31, %34 : vector<2x16xf32>
    %36 = arith.negf %35 : vector<2x16xf32>
    %37 = math.exp %36 : vector<2x16xf32>
    %cst_28 = arith.constant 1.000000e+00 : f32
    %38 = vector.broadcast %cst_28 : f32 to vector<2x16xf32>
    %39 = arith.addf %38, %37 : vector<2x16xf32>
    %40 = arith.divf %38, %39 : vector<2x16xf32>
    %c2 = arith.constant 2 : index
    %c0_29 = arith.constant 0 : index
    %c0_30 = arith.constant 0 : index
    %41 = vector.load %arg3[%c2, %c0_29, %c0_30] : memref<4x32x16xbf16, #tpu.memory_space<vmem>>, vector<1x32x16xbf16>
    %42 = vector.shape_cast %41 : vector<1x32x16xbf16> to vector<32x16xbf16>
    %c2_31 = arith.constant 2 : index
    %c0_32 = arith.constant 0 : index
    %c0_33 = arith.constant 0 : index
    %43 = vector.load %arg4[%c2_31, %c0_32, %c0_33] : memref<4x16x16xbf16, #tpu.memory_space<vmem>>, vector<1x16x16xbf16>
    %44 = vector.shape_cast %43 : vector<1x16x16xbf16> to vector<16x16xbf16>
    %cst_34 = arith.constant dense<0.000000e+00> : vector<2x16xf32>
    %45 = tpu.matmul %4, %42, %cst_34 {dimension_numbers = #tpu.dot_dimension_numbers<[1], [0], [0], [1], [0, 0, 1, 1], [], []>} : vector<2x32xbf16>, vector<32x16xbf16>, vector<2x16xf32> -> vector<2x16xf32>
    %46 = arith.truncf %5 : vector<2x16xf32> to vector<2x16xbf16>
    %cst_35 = arith.constant dense<0.000000e+00> : vector<2x16xf32>
    %47 = tpu.matmul %46, %44, %cst_35 {dimension_numbers = #tpu.dot_dimension_numbers<[1], [0], [0], [1], [0, 0, 1, 1], [], []>} : vector<2x16xbf16>, vector<16x16xbf16>, vector<2x16xf32> -> vector<2x16xf32>
    %48 = arith.addf %45, %47 : vector<2x16xf32>
    %c2_36 = arith.constant 2 : index
    %c0_37 = arith.constant 0 : index
    %c0_38 = arith.constant 0 : index
    %49 = vector.load %arg5[%c2_36, %c0_37, %c0_38] : memref<4x1x16xf32, #tpu.memory_space<vmem>>, vector<1x1x16xf32>
    %50 = vector.shape_cast %49 : vector<1x1x16xf32> to vector<1x16xf32>
    %51 = vector.broadcast %50 : vector<1x16xf32> to vector<2x16xf32>
    %52 = arith.addf %48, %51 : vector<2x16xf32>
    %53 = math.tanh %52 : vector<2x16xf32>
    %c3 = arith.constant 3 : index
    %c0_39 = arith.constant 0 : index
    %c0_40 = arith.constant 0 : index
    %54 = vector.load %arg3[%c3, %c0_39, %c0_40] : memref<4x32x16xbf16, #tpu.memory_space<vmem>>, vector<1x32x16xbf16>
    %55 = vector.shape_cast %54 : vector<1x32x16xbf16> to vector<32x16xbf16>
    %c3_41 = arith.constant 3 : index
    %c0_42 = arith.constant 0 : index
    %c0_43 = arith.constant 0 : index
    %56 = vector.load %arg4[%c3_41, %c0_42, %c0_43] : memref<4x16x16xbf16, #tpu.memory_space<vmem>>, vector<1x16x16xbf16>
    %57 = vector.shape_cast %56 : vector<1x16x16xbf16> to vector<16x16xbf16>
    %cst_44 = arith.constant dense<0.000000e+00> : vector<2x16xf32>
    %58 = tpu.matmul %4, %55, %cst_44 {dimension_numbers = #tpu.dot_dimension_numbers<[1], [0], [0], [1], [0, 0, 1, 1], [], []>} : vector<2x32xbf16>, vector<32x16xbf16>, vector<2x16xf32> -> vector<2x16xf32>
    %59 = arith.truncf %5 : vector<2x16xf32> to vector<2x16xbf16>
    %cst_45 = arith.constant dense<0.000000e+00> : vector<2x16xf32>
    %60 = tpu.matmul %59, %57, %cst_45 {dimension_numbers = #tpu.dot_dimension_numbers<[1], [0], [0], [1], [0, 0, 1, 1], [], []>} : vector<2x16xbf16>, vector<16x16xbf16>, vector<2x16xf32> -> vector<2x16xf32>
    %61 = arith.addf %58, %60 : vector<2x16xf32>
    %c3_46 = arith.constant 3 : index
    %c0_47 = arith.constant 0 : index
    %c0_48 = arith.constant 0 : index
    %62 = vector.load %arg5[%c3_46, %c0_47, %c0_48] : memref<4x1x16xf32, #tpu.memory_space<vmem>>, vector<1x1x16xf32>
    %63 = vector.shape_cast %62 : vector<1x1x16xf32> to vector<1x16xf32>
    %64 = vector.broadcast %63 : vector<1x16xf32> to vector<2x16xf32>
    %65 = arith.addf %61, %64 : vector<2x16xf32>
    %66 = arith.negf %65 : vector<2x16xf32>
    %67 = math.exp %66 : vector<2x16xf32>
    %cst_49 = arith.constant 1.000000e+00 : f32
    %68 = vector.broadcast %cst_49 : f32 to vector<2x16xf32>
    %69 = arith.addf %68, %67 : vector<2x16xf32>
    %70 = arith.divf %68, %69 : vector<2x16xf32>
    %71 = arith.mulf %40, %6 : vector<2x16xf32>
    %72 = arith.mulf %23, %53 : vector<2x16xf32>
    %73 = arith.addf %71, %72 : vector<2x16xf32>
    %74 = math.tanh %73 : vector<2x16xf32>
    %75 = arith.mulf %70, %74 : vector<2x16xf32>
    %c0_50 = arith.constant 0 : index
    %c0_51 = arith.constant 0 : index
    %76 = vector.load %arg15[%c0_50, %c0_51] : memref<2x16xf32, #tpu.memory_space<vmem>>, vector<2x16xf32>
    tpu.vector_store %arg15[%c0_50, %c0_51], %75 {strides = array<i32>} : memref<2x16xf32, #tpu.memory_space<vmem>>, vector<2x16xf32>,
    %c0_52 = arith.constant 0 : index
    %c0_53 = arith.constant 0 : index
    %77 = vector.load %arg16[%c0_52, %c0_53] : memref<2x16xf32, #tpu.memory_space<vmem>>, vector<2x16xf32>
    tpu.vector_store %arg16[%c0_52, %c0_53], %73 {strides = array<i32>} : memref<2x16xf32, #tpu.memory_space<vmem>>, vector<2x16xf32>,
    %78 = arith.truncf %75 : vector<2x16xf32> to vector<2x16xbf16>
    %c0_54 = arith.constant 0 : index
    %c0_55 = arith.constant 0 : index
    %c0_56 = arith.constant 0 : index
    %79 = vector.load %arg9[%c0_54, %c0_55, %c0_56] : memref<1x2x16xbf16, #tpu.memory_space<vmem>>, vector<1x2x16xbf16>
    %80 = vector.shape_cast %79 : vector<1x2x16xbf16> to vector<2x16xbf16>
    %81 = vector.shape_cast %78 : vector<2x16xbf16> to vector<1x2x16xbf16>
    tpu.vector_store %arg9[%c0_54, %c0_55, %c0_56], %81 {strides = array<i32>} : memref<1x2x16xbf16, #tpu.memory_space<vmem>>, vector<1x2x16xbf16>,
    %c0_57 = arith.constant 0 : index
    %c0_58 = arith.constant 0 : index
    %c0_59 = arith.constant 0 : index
    %82 = vector.load %arg2[%c0_57, %c0_58, %c0_59] : memref<1x2x32xbf16, #tpu.memory_space<vmem>>, vector<1x2x32xbf16>
    %83 = vector.shape_cast %82 : vector<1x2x32xbf16> to vector<2x32xbf16>
    %c0_60 = arith.constant 0 : index
    %c0_61 = arith.constant 0 : index
    %84 = vector.load %arg17[%c0_60, %c0_61] : memref<2x16xf32, #tpu.memory_space<vmem>>, vector<2x16xf32>
    %c0_62 = arith.constant 0 : index
    %c0_63 = arith.constant 0 : index
    %85 = vector.load %arg18[%c0_62, %c0_63] : memref<2x16xf32, #tpu.memory_space<vmem>>, vector<2x16xf32>
    %c0_64 = arith.constant 0 : index
    %c0_65 = arith.constant 0 : index
    %c0_66 = arith.constant 0 : index
    %86 = vector.load %arg6[%c0_64, %c0_65, %c0_66] : memref<4x32x16xbf16, #tpu.memory_space<vmem>>, vector<1x32x16xbf16>
    %87 = vector.shape_cast %86 : vector<1x32x16xbf16> to vector<32x16xbf16>
    %c0_67 = arith.constant 0 : index
    %c0_68 = arith.constant 0 : index
    %c0_69 = arith.constant 0 : index
    %88 = vector.load %arg7[%c0_67, %c0_68, %c0_69] : memref<4x16x16xbf16, #tpu.memory_space<vmem>>, vector<1x16x16xbf16>
    %89 = vector.shape_cast %88 : vector<1x16x16xbf16> to vector<16x16xbf16>
    %cst_70 = arith.constant dense<0.000000e+00> : vector<2x16xf32>
    %90 = tpu.matmul %83, %87, %cst_70 {dimension_numbers = #tpu.dot_dimension_numbers<[1], [0], [0], [1], [0, 0, 1, 1], [], []>} : vector<2x32xbf16>, vector<32x16xbf16>, vector<2x16xf32> -> vector<2x16xf32>
    %91 = arith.truncf %84 : vector<2x16xf32> to vector<2x16xbf16>
    %cst_71 = arith.constant dense<0.000000e+00> : vector<2x16xf32>
    %92 = tpu.matmul %91, %89, %cst_71 {dimension_numbers = #tpu.dot_dimension_numbers<[1], [0], [0], [1], [0, 0, 1, 1], [], []>} : vector<2x16xbf16>, vector<16x16xbf16>, vector<2x16xf32> -> vector<2x16xf32>
    %93 = arith.addf %90, %92 : vector<2x16xf32>
    %c0_72 = arith.constant 0 : index
    %c0_73 = arith.constant 0 : index
    %c0_74 = arith.constant 0 : index
    %94 = vector.load %arg8[%c0_72, %c0_73, %c0_74] : memref<4x1x16xf32, #tpu.memory_space<vmem>>, vector<1x1x16xf32>
    %95 = vector.shape_cast %94 : vector<1x1x16xf32> to vector<1x16xf32>
    %96 = vector.broadcast %95 : vector<1x16xf32> to vector<2x16xf32>
    %97 = arith.addf %93, %96 : vector<2x16xf32>
    %98 = arith.negf %97 : vector<2x16xf32>
    %99 = math.exp %98 : vector<2x16xf32>
    %cst_75 = arith.constant 1.000000e+00 : f32
    %100 = vector.broadcast %cst_75 : f32 to vector<2x16xf32>
    %101 = arith.addf %100, %99 : vector<2x16xf32>
    %102 = arith.divf %100, %101 : vector<2x16xf32>
    %c1_76 = arith.constant 1 : index
    %c0_77 = arith.constant 0 : index
    %c0_78 = arith.constant 0 : index
    %103 = vector.load %arg6[%c1_76, %c0_77, %c0_78] : memref<4x32x16xbf16, #tpu.memory_space<vmem>>, vector<1x32x16xbf16>
    %104 = vector.shape_cast %103 : vector<1x32x16xbf16> to vector<32x16xbf16>
    %c1_79 = arith.constant 1 : index
    %c0_80 = arith.constant 0 : index
    %c0_81 = arith.constant 0 : index
    %105 = vector.load %arg7[%c1_79, %c0_80, %c0_81] : memref<4x16x16xbf16, #tpu.memory_space<vmem>>, vector<1x16x16xbf16>
    %106 = vector.shape_cast %105 : vector<1x16x16xbf16> to vector<16x16xbf16>
    %cst_82 = arith.constant dense<0.000000e+00> : vector<2x16xf32>
    %107 = tpu.matmul %83, %104, %cst_82 {dimension_numbers = #tpu.dot_dimension_numbers<[1], [0], [0], [1], [0, 0, 1, 1], [], []>} : vector<2x32xbf16>, vector<32x16xbf16>, vector<2x16xf32> -> vector<2x16xf32>
    %108 = arith.truncf %84 : vector<2x16xf32> to vector<2x16xbf16>
    %cst_83 = arith.constant dense<0.000000e+00> : vector<2x16xf32>
    %109 = tpu.matmul %108, %106, %cst_83 {dimension_numbers = #tpu.dot_dimension_numbers<[1], [0], [0], [1], [0, 0, 1, 1], [], []>} : vector<2x16xbf16>, vector<16x16xbf16>, vector<2x16xf32> -> vector<2x16xf32>
    %110 = arith.addf %107, %109 : vector<2x16xf32>
    %c1_84 = arith.constant 1 : index
    %c0_85 = arith.constant 0 : index
    %c0_86 = arith.constant 0 : index
    %111 = vector.load %arg8[%c1_84, %c0_85, %c0_86] : memref<4x1x16xf32, #tpu.memory_space<vmem>>, vector<1x1x16xf32>
    %112 = vector.shape_cast %111 : vector<1x1x16xf32> to vector<1x16xf32>
    %113 = vector.broadcast %112 : vector<1x16xf32> to vector<2x16xf32>
    %114 = arith.addf %110, %113 : vector<2x16xf32>
    %115 = arith.negf %114 : vector<2x16xf32>
    %116 = math.exp %115 : vector<2x16xf32>
    %cst_87 = arith.constant 1.000000e+00 : f32
    %117 = vector.broadcast %cst_87 : f32 to vector<2x16xf32>
    %118 = arith.addf %117, %116 : vector<2x16xf32>
    %119 = arith.divf %117, %118 : vector<2x16xf32>
    %c2_88 = arith.constant 2 : index
    %c0_89 = arith.constant 0 : index
    %c0_90 = arith.constant 0 : index
    %120 = vector.load %arg6[%c2_88, %c0_89, %c0_90] : memref<4x32x16xbf16, #tpu.memory_space<vmem>>, vector<1x32x16xbf16>
    %121 = vector.shape_cast %120 : vector<1x32x16xbf16> to vector<32x16xbf16>
    %c2_91 = arith.constant 2 : index
    %c0_92 = arith.constant 0 : index
    %c0_93 = arith.constant 0 : index
    %122 = vector.load %arg7[%c2_91, %c0_92, %c0_93] : memref<4x16x16xbf16, #tpu.memory_space<vmem>>, vector<1x16x16xbf16>
    %123 = vector.shape_cast %122 : vector<1x16x16xbf16> to vector<16x16xbf16>
    %cst_94 = arith.constant dense<0.000000e+00> : vector<2x16xf32>
    %124 = tpu.matmul %83, %121, %cst_94 {dimension_numbers = #tpu.dot_dimension_numbers<[1], [0], [0], [1], [0, 0, 1, 1], [], []>} : vector<2x32xbf16>, vector<32x16xbf16>, vector<2x16xf32> -> vector<2x16xf32>
    %125 = arith.truncf %84 : vector<2x16xf32> to vector<2x16xbf16>
    %cst_95 = arith.constant dense<0.000000e+00> : vector<2x16xf32>
    %126 = tpu.matmul %125, %123, %cst_95 {dimension_numbers = #tpu.dot_dimension_numbers<[1], [0], [0], [1], [0, 0, 1, 1], [], []>} : vector<2x16xbf16>, vector<16x16xbf16>, vector<2x16xf32> -> vector<2x16xf32>
    %127 = arith.addf %124, %126 : vector<2x16xf32>
    %c2_96 = arith.constant 2 : index
    %c0_97 = arith.constant 0 : index
    %c0_98 = arith.constant 0 : index
    %128 = vector.load %arg8[%c2_96, %c0_97, %c0_98] : memref<4x1x16xf32, #tpu.memory_space<vmem>>, vector<1x1x16xf32>
    %129 = vector.shape_cast %128 : vector<1x1x16xf32> to vector<1x16xf32>
    %130 = vector.broadcast %129 : vector<1x16xf32> to vector<2x16xf32>
    %131 = arith.addf %127, %130 : vector<2x16xf32>
    %132 = math.tanh %131 : vector<2x16xf32>
    %c3_99 = arith.constant 3 : index
    %c0_100 = arith.constant 0 : index
    %c0_101 = arith.constant 0 : index
    %133 = vector.load %arg6[%c3_99, %c0_100, %c0_101] : memref<4x32x16xbf16, #tpu.memory_space<vmem>>, vector<1x32x16xbf16>
    %134 = vector.shape_cast %133 : vector<1x32x16xbf16> to vector<32x16xbf16>
    %c3_102 = arith.constant 3 : index
    %c0_103 = arith.constant 0 : index
    %c0_104 = arith.constant 0 : index
    %135 = vector.load %arg7[%c3_102, %c0_103, %c0_104] : memref<4x16x16xbf16, #tpu.memory_space<vmem>>, vector<1x16x16xbf16>
    %136 = vector.shape_cast %135 : vector<1x16x16xbf16> to vector<16x16xbf16>
    %cst_105 = arith.constant dense<0.000000e+00> : vector<2x16xf32>
    %137 = tpu.matmul %83, %134, %cst_105 {dimension_numbers = #tpu.dot_dimension_numbers<[1], [0], [0], [1], [0, 0, 1, 1], [], []>} : vector<2x32xbf16>, vector<32x16xbf16>, vector<2x16xf32> -> vector<2x16xf32>
    %138 = arith.truncf %84 : vector<2x16xf32> to vector<2x16xbf16>
    %cst_106 = arith.constant dense<0.000000e+00> : vector<2x16xf32>
    %139 = tpu.matmul %138, %136, %cst_106 {dimension_numbers = #tpu.dot_dimension_numbers<[1], [0], [0], [1], [0, 0, 1, 1], [], []>} : vector<2x16xbf16>, vector<16x16xbf16>, vector<2x16xf32> -> vector<2x16xf32>
    %140 = arith.addf %137, %139 : vector<2x16xf32>
    %c3_107 = arith.constant 3 : index
    %c0_108 = arith.constant 0 : index
    %c0_109 = arith.constant 0 : index
    %141 = vector.load %arg8[%c3_107, %c0_108, %c0_109] : memref<4x1x16xf32, #tpu.memory_space<vmem>>, vector<1x1x16xf32>
    %142 = vector.shape_cast %141 : vector<1x1x16xf32> to vector<1x16xf32>
    %143 = vector.broadcast %142 : vector<1x16xf32> to vector<2x16xf32>
    %144 = arith.addf %140, %143 : vector<2x16xf32>
    %145 = arith.negf %144 : vector<2x16xf32>
    %146 = math.exp %145 : vector<2x16xf32>
    %cst_110 = arith.constant 1.000000e+00 : f32
    %147 = vector.broadcast %cst_110 : f32 to vector<2x16xf32>
    %148 = arith.addf %147, %146 : vector<2x16xf32>
    %149 = arith.divf %147, %148 : vector<2x16xf32>
    %150 = arith.mulf %119, %85 : vector<2x16xf32>
    %151 = arith.mulf %102, %132 : vector<2x16xf32>
    %152 = arith.addf %150, %151 : vector<2x16xf32>
    %153 = math.tanh %152 : vector<2x16xf32>
    %154 = arith.mulf %149, %153 : vector<2x16xf32>
    %c0_111 = arith.constant 0 : index
    %c0_112 = arith.constant 0 : index
    %155 = vector.load %arg17[%c0_111, %c0_112] : memref<2x16xf32, #tpu.memory_space<vmem>>, vector<2x16xf32>
    tpu.vector_store %arg17[%c0_111, %c0_112], %154 {strides = array<i32>} : memref<2x16xf32, #tpu.memory_space<vmem>>, vector<2x16xf32>,
    %c0_113 = arith.constant 0 : index
    %c0_114 = arith.constant 0 : index
    %156 = vector.load %arg18[%c0_113, %c0_114] : memref<2x16xf32, #tpu.memory_space<vmem>>, vector<2x16xf32>
    tpu.vector_store %arg18[%c0_113, %c0_114], %152 {strides = array<i32>} : memref<2x16xf32, #tpu.memory_space<vmem>>, vector<2x16xf32>,
    %157 = arith.truncf %154 : vector<2x16xf32> to vector<2x16xbf16>
    %c0_115 = arith.constant 0 : index
    %c0_116 = arith.constant 0 : index
    %c0_117 = arith.constant 0 : index
    %158 = vector.load %arg10[%c0_115, %c0_116, %c0_117] : memref<1x2x16xbf16, #tpu.memory_space<vmem>>, vector<1x2x16xbf16>
    %159 = vector.shape_cast %158 : vector<1x2x16xbf16> to vector<2x16xbf16>
    %160 = vector.shape_cast %157 : vector<2x16xbf16> to vector<1x2x16xbf16>
    tpu.vector_store %arg10[%c0_115, %c0_116, %c0_117], %160 {strides = array<i32>} : memref<1x2x16xbf16, #tpu.memory_space<vmem>>, vector<1x2x16xbf16>,
    %c7_i32 = arith.constant 7 : i32
    %161 = arith.cmpi eq, %arg0, %c7_i32 : i32
    %162 = arith.extui %161 : i1 to i32
    %c0_i32_118 = arith.constant 0 : i32
    %163 = arith.cmpi ne, %162, %c0_i32_118 : i32
    scf.if %163 {
      %c0_119 = arith.constant 0 : index
      %c0_120 = arith.constant 0 : index
      %164 = vector.load %arg11[%c0_119, %c0_120] : memref<2x16xf32, #tpu.memory_space<vmem>>, vector<2x16xf32>
      tpu.vector_store %arg11[%c0_119, %c0_120], %75 {strides = array<i32>} : memref<2x16xf32, #tpu.memory_space<vmem>>, vector<2x16xf32>,
      %c0_121 = arith.constant 0 : index
      %c0_122 = arith.constant 0 : index
      %165 = vector.load %arg12[%c0_121, %c0_122] : memref<2x16xf32, #tpu.memory_space<vmem>>, vector<2x16xf32>
      tpu.vector_store %arg12[%c0_121, %c0_122], %73 {strides = array<i32>} : memref<2x16xf32, #tpu.memory_space<vmem>>, vector<2x16xf32>,
      %c0_123 = arith.constant 0 : index
      %c0_124 = arith.constant 0 : index
      %166 = vector.load %arg13[%c0_123, %c0_124] : memref<2x16xf32, #tpu.memory_space<vmem>>, vector<2x16xf32>
      tpu.vector_store %arg13[%c0_123, %c0_124], %154 {strides = array<i32>} : memref<2x16xf32, #tpu.memory_space<vmem>>, vector<2x16xf32>,
      %c0_125 = arith.constant 0 : index
      %c0_126 = arith.constant 0 : index
      %167 = vector.load %arg14[%c0_125, %c0_126] : memref<2x16xf32, #tpu.memory_space<vmem>>, vector<2x16xf32>
      tpu.vector_store %arg14[%c0_125, %c0_126], %152 {strides = array<i32>} : memref<2x16xf32, #tpu.memory_space<vmem>>, vector<2x16xf32>,
    } else {
    }
    return
  }
  func.func @transform_0(%arg0: i32) -> (i32, i32, i32) {
    %c0_i32 = arith.constant 0 : i32
    %c0_i32_0 = arith.constant 0 : i32
    %c0_i32_1 = arith.constant 0 : i32
    return %arg0, %c0_i32, %c0_i32_0 : i32, i32, i32
  }
  func.func @transform_1(%arg0: i32) -> (i32, i32, i32) {
    %c7_i32 = arith.constant 7 : i32
    %0 = arith.subi %c7_i32, %arg0 : i32
    %c0_i32 = arith.constant 0 : i32
    %c0_i32_0 = arith.constant 0 : i32
    %c0_i32_1 = arith.constant 0 : i32
    return %0, %c0_i32, %c0_i32_0 : i32, i32, i32
  }
  func.func @transform_2(%arg0: i32) -> (i32, i32, i32) {
    %c0_i32 = arith.constant 0 : i32
    %c0_i32_0 = arith.constant 0 : i32
    %c0_i32_1 = arith.constant 0 : i32
    %c0_i32_2 = arith.constant 0 : i32
    return %c0_i32, %c0_i32_0, %c0_i32_1 : i32, i32, i32
  }
  func.func @transform_3(%arg0: i32) -> (i32, i32, i32) {
    %c0_i32 = arith.constant 0 : i32
    %c0_i32_0 = arith.constant 0 : i32
    %c0_i32_1 = arith.constant 0 : i32
    %c0_i32_2 = arith.constant 0 : i32
    return %c0_i32, %c0_i32_0, %c0_i32_1 : i32, i32, i32
  }
  func.func @transform_4(%arg0: i32) -> (i32, i32, i32) {
    %c0_i32 = arith.constant 0 : i32
    %c0_i32_0 = arith.constant 0 : i32
    %c0_i32_1 = arith.constant 0 : i32
    %c0_i32_2 = arith.constant 0 : i32
    return %c0_i32, %c0_i32_0, %c0_i32_1 : i32, i32, i32
  }
  func.func @transform_5(%arg0: i32) -> (i32, i32, i32) {
    %c0_i32 = arith.constant 0 : i32
    %c0_i32_0 = arith.constant 0 : i32
    %c0_i32_1 = arith.constant 0 : i32
    %c0_i32_2 = arith.constant 0 : i32
    return %c0_i32, %c0_i32_0, %c0_i32_1 : i32, i32, i32
  }
  func.func @transform_6(%arg0: i32) -> (i32, i32, i32) {
    %c0_i32 = arith.constant 0 : i32
    %c0_i32_0 = arith.constant 0 : i32
    %c0_i32_1 = arith.constant 0 : i32
    %c0_i32_2 = arith.constant 0 : i32
    return %c0_i32, %c0_i32_0, %c0_i32_1 : i32, i32, i32
  }
  func.func @transform_7(%arg0: i32) -> (i32, i32, i32) {
    %c0_i32 = arith.constant 0 : i32
    %c0_i32_0 = arith.constant 0 : i32
    %c0_i32_1 = arith.constant 0 : i32
    %c0_i32_2 = arith.constant 0 : i32
    return %c0_i32, %c0_i32_0, %c0_i32_1 : i32, i32, i32
  }
  func.func @transform_8(%arg0: i32) -> (i32, i32, i32) {
    %c0_i32 = arith.constant 0 : i32
    %c0_i32_0 = arith.constant 0 : i32
    %c0_i32_1 = arith.constant 0 : i32
    return %arg0, %c0_i32, %c0_i32_0 : i32, i32, i32
  }
  func.func @transform_9(%arg0: i32) -> (i32, i32, i32) {
    %c7_i32 = arith.constant 7 : i32
    %0 = arith.subi %c7_i32, %arg0 : i32
    %c0_i32 = arith.constant 0 : i32
    %c0_i32_0 = arith.constant 0 : i32
    %c0_i32_1 = arith.constant 0 : i32
    return %0, %c0_i32, %c0_i32_0 : i32, i32, i32
  }
  func.func @transform_10(%arg0: i32) -> (i32, i32) {
    %c0_i32 = arith.constant 0 : i32
    %c0_i32_0 = arith.constant 0 : i32
    %c0_i32_1 = arith.constant 0 : i32
    return %c0_i32, %c0_i32_0 : i32, i32
  }
  func.func @transform_11(%arg0: i32) -> (i32, i32) {
    %c0_i32 = arith.constant 0 : i32
    %c0_i32_0 = arith.constant 0 : i32
    %c0_i32_1 = arith.constant 0 : i32
    return %c0_i32, %c0_i32_0 : i32, i32
  }
  func.func @transform_12(%arg0: i32) -> (i32, i32) {
    %c0_i32 = arith.constant 0 : i32
    %c0_i32_0 = arith.constant 0 : i32
    %c0_i32_1 = arith.constant 0 : i32
    return %c0_i32, %c0_i32_0 : i32, i32
  }
  func.func @transform_13(%arg0: i32) -> (i32, i32) {
    %c0_i32 = arith.constant 0 : i32
    %c0_i32_0 = arith.constant 0 : i32
    %c0_i32_1 = arith.constant 0 : i32
    return %c0_i32, %c0_i32_0 : i32, i32
  }
}

module attributes {stable_mosaic.version = 11 : i64} {
  func.func @_decoder_kernel(%arg0: i32, %arg1: memref<1x2x32xbf16, #tpu.memory_space<vmem>>, %arg2: memref<2x8x32xbf16, #tpu.memory_space<vmem>>, %arg3: memref<2x32xf32, #tpu.memory_space<vmem>>, %arg4: memref<2x32xf32, #tpu.memory_space<vmem>>, %arg5: memref<4x32x32xbf16, #tpu.memory_space<vmem>>, %arg6: memref<4x32x32xbf16, #tpu.memory_space<vmem>>, %arg7: memref<4x32x32xbf16, #tpu.memory_space<vmem>>, %arg8: memref<4x1x32xf32, #tpu.memory_space<vmem>>, %arg9: memref<32x32xbf16, #tpu.memory_space<vmem>>, %arg10: memref<32x32xbf16, #tpu.memory_space<vmem>>, %arg11: memref<32x32xbf16, #tpu.memory_space<vmem>>, %arg12: memref<1x2x32xf32, #tpu.memory_space<vmem>>, %arg13: memref<2x8xf32, #tpu.memory_space<vmem>>, %arg14: memref<2x32xf32, #tpu.memory_space<vmem>>, %arg15: memref<2x32xf32, #tpu.memory_space<vmem>>, %arg16: memref<2x32xf32, #tpu.memory_space<vmem>>) attributes {dimension_semantics = [#tpu.dimension_semantics<arbitrary>], iteration_bounds = array<i64: 6>, scalar_prefetch = 0 : i64, scratch_operands = 3 : i64, tpu.core_type = #tpu.core_type<tc>, window_params = [{transform_indices = @transform_0, window_bounds = array<i64: 1, 2, 32>}, {pipeline_mode = #tpu.pipeline_mode<synchronous>, transform_indices = @transform_1, window_bounds = array<i64: 2, 8, 32>}, {pipeline_mode = #tpu.pipeline_mode<synchronous>, transform_indices = @transform_2, window_bounds = array<i64: 2, 32>}, {pipeline_mode = #tpu.pipeline_mode<synchronous>, transform_indices = @transform_3, window_bounds = array<i64: 2, 32>}, {pipeline_mode = #tpu.pipeline_mode<synchronous>, transform_indices = @transform_4, window_bounds = array<i64: 4, 32, 32>}, {pipeline_mode = #tpu.pipeline_mode<synchronous>, transform_indices = @transform_5, window_bounds = array<i64: 4, 32, 32>}, {pipeline_mode = #tpu.pipeline_mode<synchronous>, transform_indices = @transform_6, window_bounds = array<i64: 4, 32, 32>}, {pipeline_mode = #tpu.pipeline_mode<synchronous>, transform_indices = @transform_7, window_bounds = array<i64: 4, 1, 32>}, {pipeline_mode = #tpu.pipeline_mode<synchronous>, transform_indices = @transform_8, window_bounds = array<i64: 32, 32>}, {pipeline_mode = #tpu.pipeline_mode<synchronous>, transform_indices = @transform_9, window_bounds = array<i64: 32, 32>}, {pipeline_mode = #tpu.pipeline_mode<synchronous>, transform_indices = @transform_10, window_bounds = array<i64: 32, 32>}, {transform_indices = @transform_11, window_bounds = array<i64: 1, 2, 32>}, {pipeline_mode = #tpu.pipeline_mode<synchronous>, transform_indices = @transform_12, window_bounds = array<i64: 2, 8>}]} {
    %c0_i32 = arith.constant 0 : i32
    %0 = arith.cmpi eq, %arg0, %c0_i32 : i32
    %1 = arith.extui %0 : i1 to i32
    %c0_i32_0 = arith.constant 0 : i32
    %2 = arith.cmpi ne, %1, %c0_i32_0 : i32
    scf.if %2 {
      %c0_94 = arith.constant 0 : index
      %c0_95 = arith.constant 0 : index
      %134 = vector.load %arg3[%c0_94, %c0_95] : memref<2x32xf32, #tpu.memory_space<vmem>>, vector<2x32xf32>
      %c0_96 = arith.constant 0 : index
      %c0_97 = arith.constant 0 : index
      %135 = vector.load %arg14[%c0_96, %c0_97] : memref<2x32xf32, #tpu.memory_space<vmem>>, vector<2x32xf32>
      tpu.vector_store %arg14[%c0_96, %c0_97], %134 {strides = array<i32>} : memref<2x32xf32, #tpu.memory_space<vmem>>, vector<2x32xf32>,
      %c0_98 = arith.constant 0 : index
      %c0_99 = arith.constant 0 : index
      %136 = vector.load %arg4[%c0_98, %c0_99] : memref<2x32xf32, #tpu.memory_space<vmem>>, vector<2x32xf32>
      %c0_100 = arith.constant 0 : index
      %c0_101 = arith.constant 0 : index
      %137 = vector.load %arg15[%c0_100, %c0_101] : memref<2x32xf32, #tpu.memory_space<vmem>>, vector<2x32xf32>
      tpu.vector_store %arg15[%c0_100, %c0_101], %136 {strides = array<i32>} : memref<2x32xf32, #tpu.memory_space<vmem>>, vector<2x32xf32>,
      %cst_102 = arith.constant 0.000000e+00 : f32
      %138 = vector.broadcast %cst_102 : f32 to vector<2x32xf32>
      %c0_103 = arith.constant 0 : index
      %c0_104 = arith.constant 0 : index
      %139 = vector.load %arg16[%c0_103, %c0_104] : memref<2x32xf32, #tpu.memory_space<vmem>>, vector<2x32xf32>
      tpu.vector_store %arg16[%c0_103, %c0_104], %138 {strides = array<i32>} : memref<2x32xf32, #tpu.memory_space<vmem>>, vector<2x32xf32>,
    } else {
    }
    %c0 = arith.constant 0 : index
    %c0_1 = arith.constant 0 : index
    %c0_2 = arith.constant 0 : index
    %3 = vector.load %arg1[%c0, %c0_1, %c0_2] : memref<1x2x32xbf16, #tpu.memory_space<vmem>>, vector<1x2x32xbf16>
    %4 = vector.shape_cast %3 : vector<1x2x32xbf16> to vector<2x32xbf16>
    %c0_3 = arith.constant 0 : index
    %c0_4 = arith.constant 0 : index
    %5 = vector.load %arg14[%c0_3, %c0_4] : memref<2x32xf32, #tpu.memory_space<vmem>>, vector<2x32xf32>
    %c0_5 = arith.constant 0 : index
    %c0_6 = arith.constant 0 : index
    %6 = vector.load %arg16[%c0_5, %c0_6] : memref<2x32xf32, #tpu.memory_space<vmem>>, vector<2x32xf32>
    %c0_7 = arith.constant 0 : index
    %c0_8 = arith.constant 0 : index
    %c0_9 = arith.constant 0 : index
    %7 = vector.load %arg5[%c0_7, %c0_8, %c0_9] : memref<4x32x32xbf16, #tpu.memory_space<vmem>>, vector<1x32x32xbf16>
    %8 = vector.shape_cast %7 : vector<1x32x32xbf16> to vector<32x32xbf16>
    %c0_10 = arith.constant 0 : index
    %c0_11 = arith.constant 0 : index
    %c0_12 = arith.constant 0 : index
    %9 = vector.load %arg6[%c0_10, %c0_11, %c0_12] : memref<4x32x32xbf16, #tpu.memory_space<vmem>>, vector<1x32x32xbf16>
    %10 = vector.shape_cast %9 : vector<1x32x32xbf16> to vector<32x32xbf16>
    %c0_13 = arith.constant 0 : index
    %c0_14 = arith.constant 0 : index
    %c0_15 = arith.constant 0 : index
    %11 = vector.load %arg7[%c0_13, %c0_14, %c0_15] : memref<4x32x32xbf16, #tpu.memory_space<vmem>>, vector<1x32x32xbf16>
    %12 = vector.shape_cast %11 : vector<1x32x32xbf16> to vector<32x32xbf16>
    %cst = arith.constant dense<0.000000e+00> : vector<2x32xf32>
    %13 = tpu.matmul %4, %8, %cst {dimension_numbers = #tpu.dot_dimension_numbers<[1], [0], [0], [1], [0, 0, 1, 1], [], []>} : vector<2x32xbf16>, vector<32x32xbf16>, vector<2x32xf32> -> vector<2x32xf32>
    %14 = arith.truncf %6 : vector<2x32xf32> to vector<2x32xbf16>
    %cst_16 = arith.constant dense<0.000000e+00> : vector<2x32xf32>
    %15 = tpu.matmul %14, %10, %cst_16 {dimension_numbers = #tpu.dot_dimension_numbers<[1], [0], [0], [1], [0, 0, 1, 1], [], []>} : vector<2x32xbf16>, vector<32x32xbf16>, vector<2x32xf32> -> vector<2x32xf32>
    %16 = arith.addf %13, %15 : vector<2x32xf32>
    %17 = arith.truncf %5 : vector<2x32xf32> to vector<2x32xbf16>
    %cst_17 = arith.constant dense<0.000000e+00> : vector<2x32xf32>
    %18 = tpu.matmul %17, %12, %cst_17 {dimension_numbers = #tpu.dot_dimension_numbers<[1], [0], [0], [1], [0, 0, 1, 1], [], []>} : vector<2x32xbf16>, vector<32x32xbf16>, vector<2x32xf32> -> vector<2x32xf32>
    %19 = arith.addf %16, %18 : vector<2x32xf32>
    %c0_18 = arith.constant 0 : index
    %c0_19 = arith.constant 0 : index
    %c0_20 = arith.constant 0 : index
    %20 = vector.load %arg8[%c0_18, %c0_19, %c0_20] : memref<4x1x32xf32, #tpu.memory_space<vmem>>, vector<1x1x32xf32>
    %21 = vector.shape_cast %20 : vector<1x1x32xf32> to vector<1x32xf32>
    %22 = vector.broadcast %21 : vector<1x32xf32> to vector<2x32xf32>
    %23 = arith.addf %19, %22 : vector<2x32xf32>
    %24 = arith.negf %23 : vector<2x32xf32>
    %25 = math.exp %24 : vector<2x32xf32>
    %cst_21 = arith.constant 1.000000e+00 : f32
    %26 = vector.broadcast %cst_21 : f32 to vector<2x32xf32>
    %27 = arith.addf %26, %25 : vector<2x32xf32>
    %28 = arith.divf %26, %27 : vector<2x32xf32>
    %c1 = arith.constant 1 : index
    %c0_22 = arith.constant 0 : index
    %c0_23 = arith.constant 0 : index
    %29 = vector.load %arg5[%c1, %c0_22, %c0_23] : memref<4x32x32xbf16, #tpu.memory_space<vmem>>, vector<1x32x32xbf16>
    %30 = vector.shape_cast %29 : vector<1x32x32xbf16> to vector<32x32xbf16>
    %c1_24 = arith.constant 1 : index
    %c0_25 = arith.constant 0 : index
    %c0_26 = arith.constant 0 : index
    %31 = vector.load %arg6[%c1_24, %c0_25, %c0_26] : memref<4x32x32xbf16, #tpu.memory_space<vmem>>, vector<1x32x32xbf16>
    %32 = vector.shape_cast %31 : vector<1x32x32xbf16> to vector<32x32xbf16>
    %c1_27 = arith.constant 1 : index
    %c0_28 = arith.constant 0 : index
    %c0_29 = arith.constant 0 : index
    %33 = vector.load %arg7[%c1_27, %c0_28, %c0_29] : memref<4x32x32xbf16, #tpu.memory_space<vmem>>, vector<1x32x32xbf16>
    %34 = vector.shape_cast %33 : vector<1x32x32xbf16> to vector<32x32xbf16>
    %cst_30 = arith.constant dense<0.000000e+00> : vector<2x32xf32>
    %35 = tpu.matmul %4, %30, %cst_30 {dimension_numbers = #tpu.dot_dimension_numbers<[1], [0], [0], [1], [0, 0, 1, 1], [], []>} : vector<2x32xbf16>, vector<32x32xbf16>, vector<2x32xf32> -> vector<2x32xf32>
    %36 = arith.truncf %6 : vector<2x32xf32> to vector<2x32xbf16>
    %cst_31 = arith.constant dense<0.000000e+00> : vector<2x32xf32>
    %37 = tpu.matmul %36, %32, %cst_31 {dimension_numbers = #tpu.dot_dimension_numbers<[1], [0], [0], [1], [0, 0, 1, 1], [], []>} : vector<2x32xbf16>, vector<32x32xbf16>, vector<2x32xf32> -> vector<2x32xf32>
    %38 = arith.addf %35, %37 : vector<2x32xf32>
    %39 = arith.truncf %5 : vector<2x32xf32> to vector<2x32xbf16>
    %cst_32 = arith.constant dense<0.000000e+00> : vector<2x32xf32>
    %40 = tpu.matmul %39, %34, %cst_32 {dimension_numbers = #tpu.dot_dimension_numbers<[1], [0], [0], [1], [0, 0, 1, 1], [], []>} : vector<2x32xbf16>, vector<32x32xbf16>, vector<2x32xf32> -> vector<2x32xf32>
    %41 = arith.addf %38, %40 : vector<2x32xf32>
    %c1_33 = arith.constant 1 : index
    %c0_34 = arith.constant 0 : index
    %c0_35 = arith.constant 0 : index
    %42 = vector.load %arg8[%c1_33, %c0_34, %c0_35] : memref<4x1x32xf32, #tpu.memory_space<vmem>>, vector<1x1x32xf32>
    %43 = vector.shape_cast %42 : vector<1x1x32xf32> to vector<1x32xf32>
    %44 = vector.broadcast %43 : vector<1x32xf32> to vector<2x32xf32>
    %45 = arith.addf %41, %44 : vector<2x32xf32>
    %46 = arith.negf %45 : vector<2x32xf32>
    %47 = math.exp %46 : vector<2x32xf32>
    %cst_36 = arith.constant 1.000000e+00 : f32
    %48 = vector.broadcast %cst_36 : f32 to vector<2x32xf32>
    %49 = arith.addf %48, %47 : vector<2x32xf32>
    %50 = arith.divf %48, %49 : vector<2x32xf32>
    %c2 = arith.constant 2 : index
    %c0_37 = arith.constant 0 : index
    %c0_38 = arith.constant 0 : index
    %51 = vector.load %arg5[%c2, %c0_37, %c0_38] : memref<4x32x32xbf16, #tpu.memory_space<vmem>>, vector<1x32x32xbf16>
    %52 = vector.shape_cast %51 : vector<1x32x32xbf16> to vector<32x32xbf16>
    %c2_39 = arith.constant 2 : index
    %c0_40 = arith.constant 0 : index
    %c0_41 = arith.constant 0 : index
    %53 = vector.load %arg6[%c2_39, %c0_40, %c0_41] : memref<4x32x32xbf16, #tpu.memory_space<vmem>>, vector<1x32x32xbf16>
    %54 = vector.shape_cast %53 : vector<1x32x32xbf16> to vector<32x32xbf16>
    %c2_42 = arith.constant 2 : index
    %c0_43 = arith.constant 0 : index
    %c0_44 = arith.constant 0 : index
    %55 = vector.load %arg7[%c2_42, %c0_43, %c0_44] : memref<4x32x32xbf16, #tpu.memory_space<vmem>>, vector<1x32x32xbf16>
    %56 = vector.shape_cast %55 : vector<1x32x32xbf16> to vector<32x32xbf16>
    %cst_45 = arith.constant dense<0.000000e+00> : vector<2x32xf32>
    %57 = tpu.matmul %4, %52, %cst_45 {dimension_numbers = #tpu.dot_dimension_numbers<[1], [0], [0], [1], [0, 0, 1, 1], [], []>} : vector<2x32xbf16>, vector<32x32xbf16>, vector<2x32xf32> -> vector<2x32xf32>
    %58 = arith.truncf %6 : vector<2x32xf32> to vector<2x32xbf16>
    %cst_46 = arith.constant dense<0.000000e+00> : vector<2x32xf32>
    %59 = tpu.matmul %58, %54, %cst_46 {dimension_numbers = #tpu.dot_dimension_numbers<[1], [0], [0], [1], [0, 0, 1, 1], [], []>} : vector<2x32xbf16>, vector<32x32xbf16>, vector<2x32xf32> -> vector<2x32xf32>
    %60 = arith.addf %57, %59 : vector<2x32xf32>
    %61 = arith.truncf %5 : vector<2x32xf32> to vector<2x32xbf16>
    %cst_47 = arith.constant dense<0.000000e+00> : vector<2x32xf32>
    %62 = tpu.matmul %61, %56, %cst_47 {dimension_numbers = #tpu.dot_dimension_numbers<[1], [0], [0], [1], [0, 0, 1, 1], [], []>} : vector<2x32xbf16>, vector<32x32xbf16>, vector<2x32xf32> -> vector<2x32xf32>
    %63 = arith.addf %60, %62 : vector<2x32xf32>
    %c2_48 = arith.constant 2 : index
    %c0_49 = arith.constant 0 : index
    %c0_50 = arith.constant 0 : index
    %64 = vector.load %arg8[%c2_48, %c0_49, %c0_50] : memref<4x1x32xf32, #tpu.memory_space<vmem>>, vector<1x1x32xf32>
    %65 = vector.shape_cast %64 : vector<1x1x32xf32> to vector<1x32xf32>
    %66 = vector.broadcast %65 : vector<1x32xf32> to vector<2x32xf32>
    %67 = arith.addf %63, %66 : vector<2x32xf32>
    %68 = math.tanh %67 : vector<2x32xf32>
    %c3 = arith.constant 3 : index
    %c0_51 = arith.constant 0 : index
    %c0_52 = arith.constant 0 : index
    %69 = vector.load %arg5[%c3, %c0_51, %c0_52] : memref<4x32x32xbf16, #tpu.memory_space<vmem>>, vector<1x32x32xbf16>
    %70 = vector.shape_cast %69 : vector<1x32x32xbf16> to vector<32x32xbf16>
    %c3_53 = arith.constant 3 : index
    %c0_54 = arith.constant 0 : index
    %c0_55 = arith.constant 0 : index
    %71 = vector.load %arg6[%c3_53, %c0_54, %c0_55] : memref<4x32x32xbf16, #tpu.memory_space<vmem>>, vector<1x32x32xbf16>
    %72 = vector.shape_cast %71 : vector<1x32x32xbf16> to vector<32x32xbf16>
    %c3_56 = arith.constant 3 : index
    %c0_57 = arith.constant 0 : index
    %c0_58 = arith.constant 0 : index
    %73 = vector.load %arg7[%c3_56, %c0_57, %c0_58] : memref<4x32x32xbf16, #tpu.memory_space<vmem>>, vector<1x32x32xbf16>
    %74 = vector.shape_cast %73 : vector<1x32x32xbf16> to vector<32x32xbf16>
    %cst_59 = arith.constant dense<0.000000e+00> : vector<2x32xf32>
    %75 = tpu.matmul %4, %70, %cst_59 {dimension_numbers = #tpu.dot_dimension_numbers<[1], [0], [0], [1], [0, 0, 1, 1], [], []>} : vector<2x32xbf16>, vector<32x32xbf16>, vector<2x32xf32> -> vector<2x32xf32>
    %76 = arith.truncf %6 : vector<2x32xf32> to vector<2x32xbf16>
    %cst_60 = arith.constant dense<0.000000e+00> : vector<2x32xf32>
    %77 = tpu.matmul %76, %72, %cst_60 {dimension_numbers = #tpu.dot_dimension_numbers<[1], [0], [0], [1], [0, 0, 1, 1], [], []>} : vector<2x32xbf16>, vector<32x32xbf16>, vector<2x32xf32> -> vector<2x32xf32>
    %78 = arith.addf %75, %77 : vector<2x32xf32>
    %79 = arith.truncf %5 : vector<2x32xf32> to vector<2x32xbf16>
    %cst_61 = arith.constant dense<0.000000e+00> : vector<2x32xf32>
    %80 = tpu.matmul %79, %74, %cst_61 {dimension_numbers = #tpu.dot_dimension_numbers<[1], [0], [0], [1], [0, 0, 1, 1], [], []>} : vector<2x32xbf16>, vector<32x32xbf16>, vector<2x32xf32> -> vector<2x32xf32>
    %81 = arith.addf %78, %80 : vector<2x32xf32>
    %c3_62 = arith.constant 3 : index
    %c0_63 = arith.constant 0 : index
    %c0_64 = arith.constant 0 : index
    %82 = vector.load %arg8[%c3_62, %c0_63, %c0_64] : memref<4x1x32xf32, #tpu.memory_space<vmem>>, vector<1x1x32xf32>
    %83 = vector.shape_cast %82 : vector<1x1x32xf32> to vector<1x32xf32>
    %84 = vector.broadcast %83 : vector<1x32xf32> to vector<2x32xf32>
    %85 = arith.addf %81, %84 : vector<2x32xf32>
    %86 = arith.negf %85 : vector<2x32xf32>
    %87 = math.exp %86 : vector<2x32xf32>
    %cst_65 = arith.constant 1.000000e+00 : f32
    %88 = vector.broadcast %cst_65 : f32 to vector<2x32xf32>
    %89 = arith.addf %88, %87 : vector<2x32xf32>
    %90 = arith.divf %88, %89 : vector<2x32xf32>
    %c0_66 = arith.constant 0 : index
    %c0_67 = arith.constant 0 : index
    %91 = vector.load %arg15[%c0_66, %c0_67] : memref<2x32xf32, #tpu.memory_space<vmem>>, vector<2x32xf32>
    %92 = arith.mulf %50, %91 : vector<2x32xf32>
    %93 = arith.mulf %28, %68 : vector<2x32xf32>
    %94 = arith.addf %92, %93 : vector<2x32xf32>
    %95 = math.tanh %94 : vector<2x32xf32>
    %96 = arith.mulf %90, %95 : vector<2x32xf32>
    %c0_68 = arith.constant 0 : index
    %c0_69 = arith.constant 0 : index
    %97 = vector.load %arg15[%c0_68, %c0_69] : memref<2x32xf32, #tpu.memory_space<vmem>>, vector<2x32xf32>
    tpu.vector_store %arg15[%c0_68, %c0_69], %94 {strides = array<i32>} : memref<2x32xf32, #tpu.memory_space<vmem>>, vector<2x32xf32>,
    %c0_70 = arith.constant 0 : index
    %c0_71 = arith.constant 0 : index
    %98 = vector.load %arg14[%c0_70, %c0_71] : memref<2x32xf32, #tpu.memory_space<vmem>>, vector<2x32xf32>
    tpu.vector_store %arg14[%c0_70, %c0_71], %96 {strides = array<i32>} : memref<2x32xf32, #tpu.memory_space<vmem>>, vector<2x32xf32>,
    %c0_72 = arith.constant 0 : index
    %c0_73 = arith.constant 0 : index
    %c0_74 = arith.constant 0 : index
    %99 = vector.load %arg2[%c0_72, %c0_73, %c0_74] : memref<2x8x32xbf16, #tpu.memory_space<vmem>>, vector<2x8x32xbf16>
    %c0_75 = arith.constant 0 : index
    %c0_76 = arith.constant 0 : index
    %100 = vector.load %arg9[%c0_75, %c0_76] : memref<32x32xbf16, #tpu.memory_space<vmem>>, vector<32x32xbf16>
    %101 = arith.truncf %96 : vector<2x32xf32> to vector<2x32xbf16>
    %cst_77 = arith.constant dense<0.000000e+00> : vector<2x32xf32>
    %102 = tpu.matmul %101, %100, %cst_77 {dimension_numbers = #tpu.dot_dimension_numbers<[1], [0], [0], [1], [0, 0, 1, 1], [], []>} : vector<2x32xbf16>, vector<32x32xbf16>, vector<2x32xf32> -> vector<2x32xf32>
    %103 = arith.truncf %102 : vector<2x32xf32> to vector<2x32xbf16>
    %104 = vector.shape_cast %103 : vector<2x32xbf16> to vector<2x1x32xbf16>
    "tpu.trace_start"() <{level = 10 : i32, message = "bqh,bsh->bqs"}> : () -> ()
    %cst_78 = arith.constant dense<0.000000e+00> : vector<2x1x8xf32>
    %105 = tpu.matmul %104, %99, %cst_78 {dimension_numbers = #tpu.dot_dimension_numbers<[2], [2], [1], [1], [0, 0, 0, 1, 1, 1], [0], [0]>} : vector<2x1x32xbf16>, vector<2x8x32xbf16>, vector<2x1x8xf32> -> vector<2x1x8xf32>
    "tpu.trace_stop"() : () -> ()
    %cst_79 = arith.constant dense<0xFF800000> : vector<2x1xf32>
    %106 = vector.multi_reduction <maximumf>, %105, %cst_79 [2] : vector<2x1x8xf32> to vector<2x1xf32>
    %107 = vector.shape_cast %106 : vector<2x1xf32> to vector<2x1x1xf32>
    %108 = vector.broadcast %107 : vector<2x1x1xf32> to vector<2x1x8xf32>
    %109 = arith.subf %105, %108 : vector<2x1x8xf32>
    %110 = math.exp %109 : vector<2x1x8xf32>
    %cst_80 = arith.constant dense<0.000000e+00> : vector<2x1xf32>
    %111 = vector.multi_reduction <add>, %110, %cst_80 [2] : vector<2x1x8xf32> to vector<2x1xf32>
    %112 = vector.shape_cast %111 : vector<2x1xf32> to vector<2x1x1xf32>
    %113 = tpu.reciprocal %112 {approx = true} : vector<2x1x1xf32> -> vector<2x1x1xf32>
    %114 = vector.broadcast %113 : vector<2x1x1xf32> to vector<2x1x8xf32>
    %115 = arith.mulf %110, %114 : vector<2x1x8xf32>
    %116 = arith.truncf %115 : vector<2x1x8xf32> to vector<2x1x8xbf16>
    "tpu.trace_start"() <{level = 10 : i32, message = "bqs,bsh->bqh"}> : () -> ()
    %cst_81 = arith.constant dense<0.000000e+00> : vector<2x1x32xf32>
    %117 = tpu.matmul %116, %99, %cst_81 {dimension_numbers = #tpu.dot_dimension_numbers<[2], [1], [1], [2], [0, 0, 0, 1, 1, 2], [0], [0]>} : vector<2x1x8xbf16>, vector<2x8x32xbf16>, vector<2x1x32xf32> -> vector<2x1x32xf32>
    "tpu.trace_stop"() : () -> ()
    %118 = vector.shape_cast %117 : vector<2x1x32xf32> to vector<2x32xf32>
    %c0_82 = arith.constant 0 : index
    %c0_83 = arith.constant 0 : index
    %119 = vector.load %arg10[%c0_82, %c0_83] : memref<32x32xbf16, #tpu.memory_space<vmem>>, vector<32x32xbf16>
    %c0_84 = arith.constant 0 : index
    %c0_85 = arith.constant 0 : index
    %120 = vector.load %arg11[%c0_84, %c0_85] : memref<32x32xbf16, #tpu.memory_space<vmem>>, vector<32x32xbf16>
    %121 = arith.truncf %118 : vector<2x32xf32> to vector<2x32xbf16>
    %cst_86 = arith.constant dense<0.000000e+00> : vector<2x32xf32>
    %122 = tpu.matmul %121, %119, %cst_86 {dimension_numbers = #tpu.dot_dimension_numbers<[1], [0], [0], [1], [0, 0, 1, 1], [], []>} : vector<2x32xbf16>, vector<32x32xbf16>, vector<2x32xf32> -> vector<2x32xf32>
    %123 = arith.truncf %96 : vector<2x32xf32> to vector<2x32xbf16>
    %cst_87 = arith.constant dense<0.000000e+00> : vector<2x32xf32>
    %124 = tpu.matmul %123, %120, %cst_87 {dimension_numbers = #tpu.dot_dimension_numbers<[1], [0], [0], [1], [0, 0, 1, 1], [], []>} : vector<2x32xbf16>, vector<32x32xbf16>, vector<2x32xf32> -> vector<2x32xf32>
    %125 = arith.addf %122, %124 : vector<2x32xf32>
    %126 = math.tanh %125 : vector<2x32xf32>
    %c0_88 = arith.constant 0 : index
    %c0_89 = arith.constant 0 : index
    %127 = vector.load %arg16[%c0_88, %c0_89] : memref<2x32xf32, #tpu.memory_space<vmem>>, vector<2x32xf32>
    tpu.vector_store %arg16[%c0_88, %c0_89], %126 {strides = array<i32>} : memref<2x32xf32, #tpu.memory_space<vmem>>, vector<2x32xf32>,
    %c0_90 = arith.constant 0 : index
    %c0_91 = arith.constant 0 : index
    %c0_92 = arith.constant 0 : index
    %128 = vector.load %arg12[%c0_90, %c0_91, %c0_92] : memref<1x2x32xf32, #tpu.memory_space<vmem>>, vector<1x2x32xf32>
    %129 = vector.shape_cast %128 : vector<1x2x32xf32> to vector<2x32xf32>
    %130 = vector.shape_cast %126 : vector<2x32xf32> to vector<1x2x32xf32>
    tpu.vector_store %arg12[%c0_90, %c0_91, %c0_92], %130 {strides = array<i32>} : memref<1x2x32xf32, #tpu.memory_space<vmem>>, vector<1x2x32xf32>,
    %c5_i32 = arith.constant 5 : i32
    %131 = arith.cmpi eq, %arg0, %c5_i32 : i32
    %132 = arith.extui %131 : i1 to i32
    %c0_i32_93 = arith.constant 0 : i32
    %133 = arith.cmpi ne, %132, %c0_i32_93 : i32
    scf.if %133 {
      %134 = vector.shape_cast %115 : vector<2x1x8xf32> to vector<2x8xf32>
      %c0_94 = arith.constant 0 : index
      %c0_95 = arith.constant 0 : index
      %135 = vector.load %arg13[%c0_94, %c0_95] : memref<2x8xf32, #tpu.memory_space<vmem>>, vector<2x8xf32>
      tpu.vector_store %arg13[%c0_94, %c0_95], %134 {strides = array<i32>} : memref<2x8xf32, #tpu.memory_space<vmem>>, vector<2x8xf32>,
    } else {
    }
    return
  }
  func.func @transform_0(%arg0: i32) -> (i32, i32, i32) {
    %c0_i32 = arith.constant 0 : i32
    %c0_i32_0 = arith.constant 0 : i32
    %c0_i32_1 = arith.constant 0 : i32
    return %arg0, %c0_i32, %c0_i32_0 : i32, i32, i32
  }
  func.func @transform_1(%arg0: i32) -> (i32, i32, i32) {
    %c0_i32 = arith.constant 0 : i32
    %c0_i32_0 = arith.constant 0 : i32
    %c0_i32_1 = arith.constant 0 : i32
    %c0_i32_2 = arith.constant 0 : i32
    return %c0_i32, %c0_i32_0, %c0_i32_1 : i32, i32, i32
  }
  func.func @transform_2(%arg0: i32) -> (i32, i32) {
    %c0_i32 = arith.constant 0 : i32
    %c0_i32_0 = arith.constant 0 : i32
    %c0_i32_1 = arith.constant 0 : i32
    return %c0_i32, %c0_i32_0 : i32, i32
  }
  func.func @transform_3(%arg0: i32) -> (i32, i32) {
    %c0_i32 = arith.constant 0 : i32
    %c0_i32_0 = arith.constant 0 : i32
    %c0_i32_1 = arith.constant 0 : i32
    return %c0_i32, %c0_i32_0 : i32, i32
  }
  func.func @transform_4(%arg0: i32) -> (i32, i32, i32) {
    %c0_i32 = arith.constant 0 : i32
    %c0_i32_0 = arith.constant 0 : i32
    %c0_i32_1 = arith.constant 0 : i32
    %c0_i32_2 = arith.constant 0 : i32
    return %c0_i32, %c0_i32_0, %c0_i32_1 : i32, i32, i32
  }
  func.func @transform_5(%arg0: i32) -> (i32, i32, i32) {
    %c0_i32 = arith.constant 0 : i32
    %c0_i32_0 = arith.constant 0 : i32
    %c0_i32_1 = arith.constant 0 : i32
    %c0_i32_2 = arith.constant 0 : i32
    return %c0_i32, %c0_i32_0, %c0_i32_1 : i32, i32, i32
  }
  func.func @transform_6(%arg0: i32) -> (i32, i32, i32) {
    %c0_i32 = arith.constant 0 : i32
    %c0_i32_0 = arith.constant 0 : i32
    %c0_i32_1 = arith.constant 0 : i32
    %c0_i32_2 = arith.constant 0 : i32
    return %c0_i32, %c0_i32_0, %c0_i32_1 : i32, i32, i32
  }
  func.func @transform_7(%arg0: i32) -> (i32, i32, i32) {
    %c0_i32 = arith.constant 0 : i32
    %c0_i32_0 = arith.constant 0 : i32
    %c0_i32_1 = arith.constant 0 : i32
    %c0_i32_2 = arith.constant 0 : i32
    return %c0_i32, %c0_i32_0, %c0_i32_1 : i32, i32, i32
  }
  func.func @transform_8(%arg0: i32) -> (i32, i32) {
    %c0_i32 = arith.constant 0 : i32
    %c0_i32_0 = arith.constant 0 : i32
    %c0_i32_1 = arith.constant 0 : i32
    return %c0_i32, %c0_i32_0 : i32, i32
  }
  func.func @transform_9(%arg0: i32) -> (i32, i32) {
    %c0_i32 = arith.constant 0 : i32
    %c0_i32_0 = arith.constant 0 : i32
    %c0_i32_1 = arith.constant 0 : i32
    return %c0_i32, %c0_i32_0 : i32, i32
  }
  func.func @transform_10(%arg0: i32) -> (i32, i32) {
    %c0_i32 = arith.constant 0 : i32
    %c0_i32_0 = arith.constant 0 : i32
    %c0_i32_1 = arith.constant 0 : i32
    return %c0_i32, %c0_i32_0 : i32, i32
  }
  func.func @transform_11(%arg0: i32) -> (i32, i32, i32) {
    %c0_i32 = arith.constant 0 : i32
    %c0_i32_0 = arith.constant 0 : i32
    %c0_i32_1 = arith.constant 0 : i32
    return %arg0, %c0_i32, %c0_i32_0 : i32, i32, i32
  }
  func.func @transform_12(%arg0: i32) -> (i32, i32) {
    %c0_i32 = arith.constant 0 : i32
    %c0_i32_0 = arith.constant 0 : i32
    %c0_i32_1 = arith.constant 0 : i32
    return %c0_i32, %c0_i32_0 : i32, i32
  }
}

</mosaic_0001>

<bundles_post_ra>
// kernel: nmt_forward_xe.2
= control target key start
LH: loop header
LB: loop body
LE: loop exit
PB: predicated region body
PF: predicated region fallthrough
CT: control target
= control target key end

     0   :  { %s1976_s25 = smov 0   ;;  %s2224_s0 = inlined_call_operand.vmem [shape: bf16[8,2,32], index: 0, kind: input, shape index: {}, may-alias: {0,1}]   ;;  %s2225_s1 = inlined_call_operand.vmem [shape: bf16[8,2,32], index: 1, kind: input, shape index: {}, may-alias: {0,1}]   ;;  %s2226_s2 = inlined_call_operand.vmem [shape: bf16[4,32,16], index: 2, kind: input, shape index: {}]   ;;  %s2227_s3 = inlined_call_operand.vmem [shape: bf16[4,16,16], index: 3, kind: input, shape index: {}]   ;;  %s2228_s4 = inlined_call_operand.vmem [shape: f32[4,1,16], index: 4, kind: input, shape index: {}]   ;;  %s2229_s5 = inlined_call_operand.vmem [shape: bf16[4,32,16], index: 5, kind: input, shape index: {}]   ;;  %s2230_s6 = inlined_call_operand.vmem [shape: bf16[4,16,16], index: 6, kind: input, shape index: {}]   ;;  %s2231_s7 = inlined_call_operand.vmem [shape: f32[4,1,16], index: 7, kind: input, shape index: {}]   ;;  %s2232_s8 = inlined_call_operand.vmem [shape: bf16[8,2,16], index: 8, kind: output, shape index: {0}]   ;;  %s2233_s9 = inlined_call_operand.vmem [shape: bf16[8,2,16], index: 9, kind: output, shape index: {1}]   ;;  %s2234_s10 = inlined_call_operand.vmem [shape: f32[2,16], index: 10, kind: output, shape index: {2}]   ;;  %s2235_s11 = inlined_call_operand.vmem [shape: f32[2,16], index: 11, kind: output, shape index: {3}]   ;;  %s2236_s12 = inlined_call_operand.vmem [shape: f32[2,16], index: 12, kind: output, shape index: {4}]   ;;  %s2237_s13 = inlined_call_operand.vmem [shape: f32[2,16], index: 13, kind: output, shape index: {5}]  }
   0x1 LB: > { %s1982_s26 = sadd.s32 4294967295, %s1901_s25   ;;  %p1575_p0 = scmp.ge.s32.totalorder %s1901_s25, 1  ;;  %s1901_s25 = sphi %s1976_s25, %s24_s25  }
   0x2   : > { %p390_p1 = scmp.lt.s32.totalorder %s1901_s25, 9 }
   0x4   : > { %p391_p2 = pnand %p1575_p0, %p390_p1 }
   0x5   : > { %p438_p3 = scmp.lt.s32.totalorder (!%p391_p2), %s1982_s26, 7  ;;  %s441_s27 = ssub.s32 (!%p391_p2), 7, %s1982_s26 }
   0x6   : > { %394 = sbr.rel (%p391_p2) target bundleno = 325 (0x145), region = 52  ;;  %p442_p4 = scmp.lt.s32.totalorder (!%p391_p2), %s441_s27, 7 }
   0x7   : > { %p1576_p5 = scmp.ne.s32.totalorder (!%p391_p2), %s1982_s26, 0 }
   0xb   : > { %s1989_s28 = scalar_select %p438_p3, %s1982_s26, 7 }
   0xc   : > { %s2239_s27 = smov (!%p442_p4, %s441_s27), 7  ;;  %458 = sbr.rel (%p1576_p5) target bundleno = 20 (0x14), region = 56 }
   0xd   : > { %s440_s14 = scalar_lea.vmem %s2224_s0, %s1989_s28  ;;  %s448_s17 = scalar_lea.vmem %s2232_s8, %s1989_s28 }
   0xe   : > { %s444_s20 = scalar_lea.vmem %s2225_s1, %s2239_s27  ;;  %s452_s23 = scalar_lea.vmem %s2233_s9, %s2239_s27 }
  0x11   : > { %vm459_vm0 = vcmask 123904   ;;  %v1903_v0 = vmov 0.0  }
  0x12   : > { %460 = vst.msk [vmem:[#allocation2] sm:$0x3] %vm459_vm0, %v1903_v0  ;;  %461 = vst.msk [vmem:[#allocation3] sm:$0x3] %vm459_vm0, %v1903_v0 }
  0x13   : > { %462 = vst.msk [vmem:[#allocation4] sm:$0x3] %vm459_vm0, %v1903_v0  ;;  %463 = vst.msk [vmem:[#allocation5] sm:$0x3] %vm459_vm0, %v1903_v0 }
  0x14 PF: > { %v1839_v1 = vld [vmem:[%s2227_s3] sm:$0xff]   ;;  %v1904_v2 = vmov 0.0   ;;  %v1840_v3 = vld [vmem:[%s2226_s2 + $0x8] sm:$0xff]   ;;  %vm1905_vm1 = vmmov 0   ;;  %vm480_vm2 = vcmask 130048   ;;  %vm536_vm3 = vcmask 261120  }
  0x15   : > { %1716 = vmatprep.subr.bf16.mxu0 %v1904_v2  ;;  %1722 = vmatprep.subr.bf16.mxu1 %v1904_v2  ;;  %v1841_v6 = vld [vmem:[%s2226_s2] sm:$0xff]   ;;  %v1842_v7 = vld [vmem:[%s2227_s3 + $0x8] sm:$0xff]   ;;  %v1843_v9 = vld [vmem:[%s2226_s2 + $0x18] sm:$0xff]   ;;  %vm957_vm4 = vcmask 123904   ;;  %vm961_vm5 = vcmask 122880   ;;  %p1673_p6 = scmp.ne.s32.totalorder %s1982_s26, 7 }
  0x16   : > { %1717 = vmatpush3.bf16.msra.mxu0 %v1839_v1  ;;  %1718 = vmatprep.mubr.msk.bf16.mxu0 %vm1905_vm1, %v1904_v2  ;;  %v464_v8 = vld [vmem:[%s440_s14] sm:$0x1]  ;;  %v1845_v10 = vld [vmem:[%s2227_s3 + $0x10] sm:$0xff]   ;;  %v1846_v12 = vld [vmem:[%s2226_s2 + $0x28] sm:$0xff]  }
  0x17   : > { %1723 = vmatpush3.bf16.msra.mxu1 %v1840_v3  ;;  %1726 = vmatprep.mubr.msk.bf16.mxu1 %vm1905_vm1, %v1904_v2  ;;  %v1844_v11 = vld [vmem:[%s2226_s2 + $0x10] sm:$0xff]   ;;  %v1848_v13 = vld [vmem:[%s2227_s3 + $0x18] sm:$0xff]   ;;  %v1847_v14 = vld [vmem:[%s2226_s2 + $0x20] sm:$0xff]  }
  0x18   : > { %1724 = vmatprep.subr.bf16.mxu1 %v1904_v2  ;;  %1730 = vmatprep.subr.bf16.mxu0 %v1904_v2  ;;  %v1849_v15 = vld [vmem:[%s2226_s2 + $0x38] sm:$0xff]   ;;  %v1851_v16 = vld [vmem:[%s2230_s6] sm:$0xff]   ;;  %v1850_v17 = vld [vmem:[%s2226_s2 + $0x30] sm:$0xff]  }
  0x19   : > { %v465_v4 = vld [vmem:[#allocation2] sm:$0x3]  ;;  %v1852_v19 = vld [vmem:[%s2229_s5 + $0x8] sm:$0xff]   ;;  %v1855_v24 = vld [vmem:[%s2229_s5 + $0x18] sm:$0xff]  }
  0x1a   : > { %v473_v5 = vpack.c.bf16 %v465_v4, %v465_v4  ;;  %v964_v18 = vld [vmem:[#allocation4] sm:$0x3]  ;;  %v1854_v21 = vld [vmem:[%s2230_s6 + $0x8] sm:$0xff]   ;;  %v963_v23 = vld [vmem:[%s444_s20] sm:$0x1] }
  0x1b   : > { %1725 = vmatpush3.bf16.msra.mxu1 %v1841_v6  ;;  %v972_v20 = vpack.c.bf16 %v964_v18, %v964_v18  ;;  %v1853_v22 = vld [vmem:[%s2229_s5] sm:$0xff]   ;;  %v1858_v25 = vld [vmem:[%s2230_s6 + $0x10] sm:$0xff]   ;;  %v1857_v27 = vld [vmem:[%s2229_s5 + $0x28] sm:$0xff]  }
  0x1c   : > { %1719 = vmatmul.mubr.msk.bf16.vlgmr.msra.gmra.mxu0 %vm480_vm2, %v473_v5  ;;  %1736 = vmatprep.subr.bf16.mxu1 %v1904_v2  ;;  %v1856_v26 = vld [vmem:[%s2229_s5 + $0x10] sm:$0xff]   ;;  %v1861_v28 = vld [vmem:[%s2230_s6 + $0x18] sm:$0xff]   ;;  %v1859_v29 = vld [vmem:[%s2229_s5 + $0x20] sm:$0xff]  }
  0x1d   : > { %1731 = vmatpush3.bf16.msra.mxu0 %v1842_v7  ;;  %1732 = vmatprep.mubr.msk.bf16.mxu0 %vm1905_vm1, %v1904_v2  ;;  %v1860_v30 = vld [vmem:[%s2229_s5 + $0x38] sm:$0xff]   ;;  %v1862_v31 = vld [vmem:[%s2229_s5 + $0x30] sm:$0xff]   ;;  %v1582_v36 = vld [vmem:[%s2228_s4] ss:$0 sm:$0xff] }
  0x1e   : > { %1744 = vmatprep.subr.bf16.mxu0 %v1904_v2  ;;  %1727 = vmatmul.mubr.msk.bf16.vlgmr.msra.gmra.mxu1 %vm536_vm3, %v464_v8  ;;  %v1596_v48 = vld [vmem:[%s2228_s4 + $0x1] ss:$0 sm:$0xff]  ;;  %v1610_v4 = vld [vmem:[%s2228_s4 + $0x2] ss:$0 sm:$0xff]  ;;  %v1623_v7 = vld [vmem:[%s2228_s4 + $0x3] ss:$0 sm:$0xff] }
  0x1f   : > { %1737 = vmatpush3.bf16.msra.mxu1 %v1843_v9  ;;  %1740 = vmatprep.mubr.msk.bf16.mxu1 %vm1905_vm1, %v1904_v2 }
  0x20   : > { %1738 = vmatprep.subr.bf16.mxu1 %v1904_v2 }
  0x23   : > { %1739 = vmatpush3.bf16.msra.mxu1 %v1844_v11 }
  0x24   : > { %1733 = vmatmul.mubr.msk.bf16.vlgmr.msra.gmra.mxu0 %vm480_vm2, %v473_v5  ;;  %1750 = vmatprep.subr.bf16.mxu1 %v1904_v2 }
  0x25   : > { %1745 = vmatpush3.bf16.msra.mxu0 %v1845_v10  ;;  %1746 = vmatprep.mubr.msk.bf16.mxu0 %vm1905_vm1, %v1904_v2 }
  0x26   : > { %1758 = vmatprep.subr.bf16.mxu0 %v1904_v2  ;;  %1741 = vmatmul.mubr.msk.bf16.vlgmr.msra.gmra.mxu1 %vm536_vm3, %v464_v8 }
  0x27   : > { %1751 = vmatpush3.bf16.msra.mxu1 %v1846_v12  ;;  %1754 = vmatprep.mubr.msk.bf16.mxu1 %vm1905_vm1, %v1904_v2 }
  0x28   : > { %1752 = vmatprep.subr.bf16.mxu1 %v1904_v2 }
  0x2b   : > { %1753 = vmatpush3.bf16.msra.mxu1 %v1847_v14 }
  0x2c   : > { %1747 = vmatmul.mubr.msk.bf16.vlgmr.msra.gmra.mxu0 %vm480_vm2, %v473_v5  ;;  %1764 = vmatprep.subr.bf16.mxu1 %v1904_v2 }
  0x2d   : > { %1759 = vmatpush3.bf16.msra.mxu0 %v1848_v13  ;;  %1760 = vmatprep.mubr.msk.bf16.mxu0 %vm1905_vm1, %v1904_v2 }
  0x2e   : > { %1772 = vmatprep.subr.bf16.mxu0 %v1904_v2  ;;  %1755 = vmatmul.mubr.msk.bf16.vlgmr.msra.gmra.mxu1 %vm536_vm3, %v464_v8 }
  0x2f   : > { %1765 = vmatpush3.bf16.msra.mxu1 %v1849_v15  ;;  %1768 = vmatprep.mubr.msk.bf16.mxu1 %vm1905_vm1, %v1904_v2 }
  0x30   : > { %1766 = vmatprep.subr.bf16.mxu1 %v1904_v2 }
  0x33   : > { %1767 = vmatpush3.bf16.msra.mxu1 %v1850_v17 }
  0x34   : > { %1761 = vmatmul.mubr.msk.bf16.vlgmr.msra.gmra.mxu0 %vm480_vm2, %v473_v5  ;;  %1778 = vmatprep.subr.bf16.mxu1 %v1904_v2 }
  0x35   : > { %1773 = vmatpush3.bf16.msra.mxu0 %v1851_v16  ;;  %1774 = vmatprep.mubr.msk.bf16.mxu0 %vm1905_vm1, %v1904_v2 }
  0x36   : > { %1786 = vmatprep.subr.bf16.mxu0 %v1904_v2  ;;  %1769 = vmatmul.mubr.msk.bf16.vlgmr.msra.gmra.mxu1 %vm536_vm3, %v464_v8 }
  0x37   : > { %1779 = vmatpush3.bf16.msra.mxu1 %v1852_v19  ;;  %1782 = vmatprep.mubr.msk.bf16.mxu1 %vm1905_vm1, %v1904_v2 }
  0x38   : > { %1780 = vmatprep.subr.bf16.mxu1 %v1904_v2 }
  0x3b   : > { %1781 = vmatpush3.bf16.msra.mxu1 %v1853_v22 }
  0x3c   : > { %1775 = vmatmul.mubr.msk.bf16.vlgmr.msra.gmra.mxu0 %vm480_vm2, %v972_v20  ;;  %1792 = vmatprep.subr.bf16.mxu1 %v1904_v2 }
  0x3d   : > { %1787 = vmatpush3.bf16.msra.mxu0 %v1854_v21  ;;  %1788 = vmatprep.mubr.msk.bf16.mxu0 %vm1905_vm1, %v1904_v2 }
  0x3e   : > { %1800 = vmatprep.subr.bf16.mxu0 %v1904_v2  ;;  %1783 = vmatmul.mubr.msk.bf16.vlgmr.msra.gmra.mxu1 %vm536_vm3, %v963_v23 }
  0x3f   : > { %1793 = vmatpush3.bf16.msra.mxu1 %v1855_v24  ;;  %1796 = vmatprep.mubr.msk.bf16.mxu1 %vm1905_vm1, %v1904_v2 }
  0x40   : > { %1794 = vmatprep.subr.bf16.mxu1 %v1904_v2 }
  0x43   : > { %1795 = vmatpush3.bf16.msra.mxu1 %v1856_v26 }
  0x44   : > { %1789 = vmatmul.mubr.msk.bf16.vlgmr.msra.gmra.mxu0 %vm480_vm2, %v972_v20  ;;  %1806 = vmatprep.subr.bf16.mxu1 %v1904_v2 }
  0x45   : > { %1801 = vmatpush3.bf16.msra.mxu0 %v1858_v25  ;;  %1802 = vmatprep.mubr.msk.bf16.mxu0 %vm1905_vm1, %v1904_v2 }
  0x46   : > { %1814 = vmatprep.subr.bf16.mxu0 %v1904_v2  ;;  %1797 = vmatmul.mubr.msk.bf16.vlgmr.msra.gmra.mxu1 %vm536_vm3, %v963_v23 }
  0x47   : > { %1807 = vmatpush3.bf16.msra.mxu1 %v1857_v27  ;;  %1810 = vmatprep.mubr.msk.bf16.mxu1 %vm1905_vm1, %v1904_v2 }
  0x48   : > { %1808 = vmatprep.subr.bf16.mxu1 %v1904_v2 }
  0x4b   : > { %1809 = vmatpush3.bf16.msra.mxu1 %v1859_v29 }
  0x4c   : > { %1803 = vmatmul.mubr.msk.bf16.vlgmr.msra.gmra.mxu0 %vm480_vm2, %v972_v20  ;;  %1820 = vmatprep.subr.bf16.mxu1 %v1904_v2 }
  0x4d   : > { %1815 = vmatpush3.bf16.msra.mxu0 %v1861_v28  ;;  %1816 = vmatprep.mubr.msk.bf16.mxu0 %vm1905_vm1, %v1904_v2 }
  0x4e   : > { %1811 = vmatmul.mubr.msk.bf16.vlgmr.msra.gmra.mxu1 %vm536_vm3, %v963_v23 }
  0x4f   : > { %1821 = vmatpush3.bf16.msra.mxu1 %v1860_v30  ;;  %1824 = vmatprep.mubr.msk.bf16.mxu1 %vm1905_vm1, %v1904_v2 }
  0x50   : > { %1822 = vmatprep.subr.bf16.mxu1 %v1904_v2 }
  0x53   : > { %1823 = vmatpush3.bf16.msra.mxu1 %v1862_v31 }
  0x54   : > { %1817 = vmatmul.mubr.msk.bf16.vlgmr.msra.gmra.mxu0 %vm480_vm2, %v972_v20 }
  0x56   : > { %1825 = vmatmul.mubr.msk.bf16.vlgmr.msra.gmra.mxu1 %vm536_vm3, %v963_v23  ;;  %v1630_v23 = vld [vmem:[%s2231_s7] ss:$0 sm:$0xff] }
  0xdc   : > { %v518_v32 = vpop.f32.mrf.mxu0 }
  0xde   : > { %v1720_v33 = vpop.f32.mrf.mxu0  ;;  %v574_v35 = vpop.f32.mrf.mxu1 }
  0xdf   : > { %v575_v37 = vadd.f32 %v574_v35, %v518_v32  ;;  %v1644_v35 = vld [vmem:[%s2231_s7 + $0x1] ss:$0 sm:$0xff] }
  0xe0   : > { %v521_v34 = vpop.f32.mrf.mxu0  ;;  %v1728_v39 = vpop.f32.mrf.mxu1 }
  0xe1   : > { %v587_v40 = vadd.f32 %v1582_v36, %v575_v37  ;;  %v466_v39 = vld [vmem:[#allocation3] sm:$0x3] }
  0xe2   : > { %v1721_v38 = vpop.f32.mrf.mxu0  ;;  %v577_v42 = vpop.f32.mrf.mxu1 }
  0xe3   : > { %v1583_v43 = vmul.f32 -1.442695, %v587_v40 }
  0xe4   : > { %v642_v41 = vpop.f32.mrf.mxu0  ;;  %v1729_v45 = vpop.f32.mrf.mxu1 }
  0xe5   : > { %1863 = vpow2.f32 %v1583_v43 }
  0xe6   : > { %v1734_v44 = vpop.f32.mrf.mxu0  ;;  %v694_v47 = vpop.f32.mrf.mxu1 }
  0xe7   : > { %v695_v49 = vadd.f32 %v694_v47, %v642_v41 }
  0xe8   : > { %v645_v46 = vpop.f32.mrf.mxu0  ;;  %v1742_v51 = vpop.f32.mrf.mxu1 }
  0xe9   : > { %v708_v52 = vadd.f32 %v1596_v48, %v695_v49 }
  0xea   : > { %v1735_v50 = vpop.f32.mrf.mxu0  ;;  %v697_v54 = vpop.f32.mrf.mxu1 }
  0xeb   : > { %v1597_v55 = vmul.f32 -1.442695, %v708_v52 }
  0xec   : > { %v763_v53 = vpop.f32.mrf.mxu0  ;;  %v1743_v57 = vpop.f32.mrf.mxu1 }
  0xed   : > { %1865 = vpow2.f32 %v1597_v55 }
  0xee   : > { %v1748_v56 = vpop.f32.mrf.mxu0  ;;  %v815_v59 = vpop.f32.mrf.mxu1 }
  0xef   : > { %v816_v2 = vadd.f32 %v815_v59, %v763_v53 }
  0xf0   : > { %v766_v58 = vpop.f32.mrf.mxu0  ;;  %v1756_v61 = vpop.f32.mrf.mxu1 }
  0xf1   : > { %v829_v11 = vadd.f32 %v1610_v4, %v816_v2  ;;  %v1658_v61 = vld [vmem:[%s2231_s7 + $0x2] ss:$0 sm:$0xff]  ;;  %v1671_v4 = vld [vmem:[%s2231_s7 + $0x3] ss:$0 sm:$0xff] }
  0xf2   : > { %v1749_v60 = vpop.f32.mrf.mxu0  ;;  %v818_v63 = vpop.f32.mrf.mxu1 }
  0xf3   : > { %v1864_v1 = vpop.eup %1863 }
  0xf4   : > { %v879_v62 = vpop.f32.mrf.mxu0  ;;  %v1757_v3 = vpop.f32.mrf.mxu1  ;;  %v591_v8 = vadd.f32 1.0, %v1864_v1 }
  0xf6   : > { %v1762_v0 = vpop.f32.mrf.mxu0  ;;  %v931_v6 = vpop.f32.mrf.mxu1  ;;  %1867 = vrcp.f32 %v591_v8 }
  0xf7   : > { %v932_v9 = vadd.f32 %v931_v6, %v879_v62  ;;  %1869 = vtanh.f32 %v829_v11 }
  0xf8   : > { %v882_v5 = vpop.f32.mrf.mxu0  ;;  %v1770_v12 = vpop.f32.mrf.mxu1 }
  0xf9   : > { %v945_v13 = vadd.f32 %v1623_v7, %v932_v9 }
  0xfa   : > { %v1763_v10 = vpop.f32.mrf.mxu0  ;;  %v1866_v15 = vpop.eup %1865 }
  0xfb   : > { %v934_v16 = vpop.f32.mrf.mxu1  ;;  %v712_v17 = vadd.f32 1.0, %v1866_v15  ;;  %v1624_v18 = vmul.f32 -1.442695, %v945_v13 }
  0xfc   : > { %v1016_v14 = vpop.f32.mrf.mxu0 }
  0xfd   : > { %v1771_v20 = vpop.f32.mrf.mxu1  ;;  %1871 = vrcp.f32 %v712_v17 }
  0xfe   : > { %v1776_v19 = vpop.f32.mrf.mxu0  ;;  %1873 = vpow2.f32 %v1624_v18 }
  0xff   : > { %v1071_v22 = vpop.f32.mrf.mxu1 }
 0x100   : > { %v1019_v21 = vpop.f32.mrf.mxu0  ;;  %v1072_v24 = vadd.f32 %v1071_v22, %v1016_v14 }
 0x101   : > { %v1784_v26 = vpop.f32.mrf.mxu1  ;;  %v965_v21 = vld [vmem:[#allocation5] sm:$0x3] }
 0x102   : > { %v1777_v25 = vpop.f32.mrf.mxu0  ;;  %v1084_v27 = vadd.f32 %v1630_v23, %v1072_v24 }
 0x103   : > { %v1074_v29 = vpop.f32.mrf.mxu1  ;;  %v1868_v38 = vpop.eup %1867 }
 0x104   : > { %v1139_v28 = vpop.f32.mrf.mxu0  ;;  %v1631_v30 = vmul.f32 -1.442695, %v1084_v27  ;;  %v1870_v41 = vpop.eup %1869 }
 0x105   : > { %v1785_v32 = vpop.f32.mrf.mxu1  ;;  %v953_v48 = vmul.f32 %v1870_v41, %v1868_v38 }
 0x106   : > { %v1790_v31 = vpop.f32.mrf.mxu0  ;;  %1875 = vpow2.f32 %v1631_v30 }
 0x107   : > { %v1191_v34 = vpop.f32.mrf.mxu1 }
 0x108   : > { %v1142_v33 = vpop.f32.mrf.mxu0  ;;  %v1192_v36 = vadd.f32 %v1191_v34, %v1139_v28 }
 0x109   : > { %v1798_v40 = vpop.f32.mrf.mxu1 }
 0x10a   : > { %v1791_v37 = vpop.f32.mrf.mxu0  ;;  %v1205_v42 = vadd.f32 %v1644_v35, %v1192_v36  ;;  %v1872_v44 = vpop.eup %1871 }
 0x10b   : > { %v1194_v45 = vpop.f32.mrf.mxu1  ;;  %v1874_v46 = vpop.eup %1873  ;;  %v952_v47 = vmul.f32 %v1872_v44, %v466_v39 }
 0x10c   : > { %v1260_v43 = vpop.f32.mrf.mxu0  ;;  %v1645_v49 = vmul.f32 -1.442695, %v1205_v42  ;;  %v949_v51 = vadd.f32 1.0, %v1874_v46 }
 0x10d   : > { %v1799_v52 = vpop.f32.mrf.mxu1  ;;  %v954_v53 = vadd.f32 %v953_v48, %v952_v47 }
 0x10e   : > { %v1804_v50 = vpop.f32.mrf.mxu0  ;;  %1877 = vpow2.f32 %v1645_v49 }
 0x10f   : > { %1879 = vrcp.f32 %v949_v51  ;;  %v1312_v55 = vpop.f32.mrf.mxu1  ;;  %959 = vst.msk [vmem:[#allocation3] sm:$0x3] %vm957_vm4, %v954_v53 }
 0x110   : > { %v1263_v54 = vpop.f32.mrf.mxu0  ;;  %1881 = vtanh.f32 %v954_v53  ;;  %v1313_v59 = vadd.f32 %v1312_v55, %v1260_v43 }
 0x111   : > { %v1812_v57 = vpop.f32.mrf.mxu1 }
 0x112   : > { %v1805_v56 = vpop.f32.mrf.mxu0  ;;  %v1326_v2 = vadd.f32 %v1658_v61, %v1313_v59 }
 0x113   : > { %v1315_v60 = vpop.f32.mrf.mxu1  ;;  %v1876_v63 = vpop.eup %1875 }
 0x114   : > { %v1376_v58 = vpop.f32.mrf.mxu0  ;;  %v1088_v5 = vadd.f32 1.0, %v1876_v63  ;;  %1883 = vtanh.f32 %v1326_v2 }
 0x115   : > { %v1813_v0 = vpop.f32.mrf.mxu1 }
 0x116   : > { %v1818_v62 = vpop.f32.mrf.mxu0  ;;  %1885 = vrcp.f32 %v1088_v5 }
 0x117   : > { %v1428_v3 = vpop.f32.mrf.mxu1 }
 0x118   : > { %v1379_v1 = vpop.f32.mrf.mxu0  ;;  %v1429_v6 = vadd.f32 %v1428_v3, %v1376_v58 }
 0x119   : > { %v1826_v8 = vpop.f32.mrf.mxu1 }
 0x11a   : > { %v1819_v7 = vpop.f32.mrf.mxu0  ;;  %v1442_v9 = vadd.f32 %v1671_v4, %v1429_v6 }
 0x11b   : > { %v1878_v10 = vpop.eup %1877  ;;  %v1431_v11 = vpop.f32.mrf.mxu1 }
 0x11c   : > { %v1880_v12 = vpop.eup %1879  ;;  %v1209_v13 = vadd.f32 1.0, %v1878_v10  ;;  %v1672_v14 = vmul.f32 -1.442695, %v1442_v9 }
 0x11d   : > { %v1882_v15 = vpop.eup %1881  ;;  %v1827_v16 = vpop.f32.mrf.mxu1 }
 0x11e   : > { %v956_v17 = vmul.f32 %v1882_v15, %v1880_v12  ;;  %1887 = vrcp.f32 %v1209_v13 }
 0x11f   : > { %1889 = vpow2.f32 %v1672_v14 }
 0x120   : > { %958 = vst.msk [vmem:[#allocation2] sm:$0x3] %vm957_vm4, %v956_v17  ;;  %v960_v18 = vpack.c.bf16 %v956_v17, %v956_v17 }
 0x121   : > { %v1884_v19 = vpop.eup %1883 }
 0x122   : > { %962 = vst.msk [vmem:[%s448_s17] sm:$0x1] %vm961_vm5, %v960_v18 }
 0x123   : > { %v1886_v20 = vpop.eup %1885 }
 0x124   : > { %v1450_v25 = vmul.f32 %v1886_v20, %v1884_v19 }
 0x12b   : > { %v1888_v22 = vpop.eup %1887 }
 0x12c   : > { %v1890_v23 = vpop.eup %1889  ;;  %v1449_v24 = vmul.f32 %v1888_v22, %v965_v21 }
 0x12d   : > { %v1446_v26 = vadd.f32 1.0, %v1890_v23 }
 0x12e   : > { %v1451_v27 = vadd.f32 %v1450_v25, %v1449_v24 }
 0x12f   : > { %1891 = vrcp.f32 %v1446_v26 }
 0x130   : > { %1893 = vtanh.f32 %v1451_v27  ;;  %1455 = vst.msk [vmem:[#allocation5] sm:$0x3] %vm957_vm4, %v1451_v27 }
 0x13c   : > { %v1892_v28 = vpop.eup %1891 }
 0x13d   : > { %v1894_v29 = vpop.eup %1893 }
 0x13e   : > { %v1453_v30 = vmul.f32 %v1894_v29, %v1892_v28  ;;  %1461 = sbr.rel (%p1673_p6) target bundleno = 325 (0x145), region = 60 }
 0x140   : > { %1454 = vst.msk [vmem:[#allocation4] sm:$0x3] %vm957_vm4, %v1453_v30  ;;  %v1456_v31 = vpack.c.bf16 %v1453_v30, %v1453_v30 }
 0x142   : > { %1457 = vst.msk [vmem:[%s452_s23] sm:$0x1] %vm961_vm5, %v1456_v31 }
 0x143   : > { %1462 = vst.msk [vmem:[%s2234_s10] sm:$0x3] %vm957_vm4, %v956_v17  ;;  %1463 = vst.msk [vmem:[%s2235_s11] sm:$0x3] %vm957_vm4, %v954_v53 }
 0x144   : > { %1464 = vst.msk [vmem:[%s2236_s12] sm:$0x3] %vm957_vm4, %v1453_v30  ;;  %1465 = vst.msk [vmem:[%s2237_s13] sm:$0x3] %vm957_vm4, %v1451_v27 }
 0x145 PF: > { %s24_s25 = sadd.s32 1, %s1901_s25  }
 0x146   : > { %p21_p7 = scmp.ge.s32.totalorder %s24_s25, 10  }
 0x148   :  { %23 = sbr.rel (!%p21_p7) target bundleno = 1 (0x1), region = 155 }

// kernel: nmt_forward_xe.3
= control target key start
LH: loop header
LB: loop body
LE: loop exit
PB: predicated region body
PF: predicated region fallthrough
CT: control target
= control target key end

     0   :  { %s2635_s0 = inlined_call_operand.vmem [shape: bf16[6,2,32], index: 0, kind: input, shape index: {}]   ;;  %s2636_s1 = inlined_call_operand.vmem [shape: bf16[2,8,32], index: 1, kind: input, shape index: {}]   ;;  %s2637_s2 = inlined_call_operand.vmem [shape: f32[2,32], index: 2, kind: input, shape index: {}]   ;;  %s2638_s3 = inlined_call_operand.vmem [shape: f32[2,32], index: 3, kind: input, shape index: {}]   ;;  %s2639_s4 = inlined_call_operand.vmem [shape: bf16[4,32,32], index: 4, kind: input, shape index: {}]   ;;  %s2640_s5 = inlined_call_operand.vmem [shape: bf16[4,32,32], index: 5, kind: input, shape index: {}]   ;;  %s2641_s6 = inlined_call_operand.vmem [shape: bf16[4,32,32], index: 6, kind: input, shape index: {}]   ;;  %s2642_s7 = inlined_call_operand.vmem [shape: f32[4,1,32], index: 7, kind: input, shape index: {}]   ;;  %s2643_s8 = inlined_call_operand.vmem [shape: bf16[32,32], index: 8, kind: input, shape index: {}]   ;;  %s2644_s9 = inlined_call_operand.vmem [shape: bf16[32,32], index: 9, kind: input, shape index: {}]   ;;  %s2645_s10 = inlined_call_operand.vmem [shape: bf16[32,32], index: 10, kind: input, shape index: {}]   ;;  %s2646_s11 = inlined_call_operand.hbm [shape: f32[6,2,32], index: 11, kind: output, shape index: {0}]   ;;  %s2647_s12 = inlined_call_operand.hbm [shape: f32[2,8], index: 12, kind: output, shape index: {1}]  }
   0x1   :  { %2650 = sst [smem:[#allocation12_spill]] %s2635_s0 }
   0x2   :  { %2651 = sst [smem:[#allocation13_spill]] %s2636_s1 }
   0x3   :  { %2652 = sst [smem:[#allocation14_spill]] %s2637_s2 }
   0x4   :  { %18 = vsyncpa [#allocation6], 0 }
   0x5   :  { %20 = vsyncpa [#allocation6 + $0x1], 0 }
   0x6   :  { %21 = vsyncpa [#allocation8], 0  ;;  %s2282_s21 = smov 0   ;;  %s2284_s22 = smov 0  }
   0x7   :  { %s2286_s23 = smov 0   ;;  %s2288_s24 = smov 0  }
   0x8 LB: > { %s2303_s25 = sadd.s32 4294967295, %s2209_s24   ;;  %s1709_s26 = sadd.s32 4294967294, %s2209_s24   ;;  %s2209_s24 = sphi %s2288_s24, %s2669_s24   ;;  %s2205_s23 = sphi %s2286_s23, %s2668_s23   ;;  %s2201_s22 = sphi %s2284_s22, %s2667_s22   ;;  %s2197_s21 = sphi %s2282_s21, %s2666_s21  }
   0x9   : > { %s2307_s27 = sadd.s32 1, %s2209_s24   ;;  %s270_s28 = sadd.s32 1, %s2205_s23 }
   0xa   : > { %s267_s29 = ssub.s32 %s2209_s24, %s2307_s27  ;;  %p280_p0 = scmp.ne.s32.totalorder %s2205_s23, %s2201_s22 }
   0xb   : > { %p268_p1 = scmp.eq.s32.totalorder %s267_s29, 0  ;;  %p2649_p2 = scmp.eq.s32.totalorder %s2303_s25, 5 }
   0xc   : > { %p286_p3 = scmp.ne.s32.totalorder %s2201_s22, %s2197_s21  ;;  %p287_p4 = scmp.eq.s32.totalorder %s1709_s26, 5 }
   0xd   : > { %s2318_s30 = scalar_select %p268_p1, %s2205_s23, %s270_s28  }
   0xe   : > { %p2322_p5 = por %p2649_p2, %p280_p0  ;;  %p2326_p6 = por %p287_p4, %p286_p3 }
   0xf   : > { %2653 = sst [smem:[#allocation11_spill]] %s2318_s30  ;;  %p1712_p7 = scmp.ge.s32.totalorder %s2209_s24, 1 }
  0x10   : > { %s2655_s14 = scalar_select %p2326_p6, 1, 0 }
  0x11   : > { %p362_p8 = scmp.lt.s32.totalorder %s2209_s24, 7 }
  0x13   : > { %p363_p9 = pnand %p1712_p7, %p362_p8 }
  0x14   : > { %s2648_s15 = sand.u32 (!%p363_p9), 1, %s2201_s22   ;;  %p402_p10 = scmp.lt.s32.totalorder (!%p363_p9), %s2303_s25, 5 }
  0x15   : > { %366 = sbr.rel (%p363_p9) target bundleno = 1491 (0x5d3), region = 64  ;;  %s2336_s16 = sshll.u32 (!%p363_p9), %s2648_s15, 1 }
  0x16   : > { %s2656_s0 = sld [smem:[#allocation12_spill]] (!%p363_p9)  ;;  %s399_s26 = scalar_lea.vmem (!%p363_p9), [#allocation5], %s2336_s16 }
  0x17   : > { %p1714_p11 = scmp.ne.s32.totalorder (!%p363_p9), %s2303_s25, 0 }
  0x1a   : > { %s2339_s17 = scalar_select %p402_p10, %s2303_s25, 5 }
  0x1b   : > { %409 = sbr.rel (%p1714_p11) target bundleno = 35 (0x23), region = 68  ;;  %s2657_s2 = sld [smem:[#allocation14_spill]] (!%p1714_p11) }
  0x1c   : > { %s404_s20 = scalar_lea.vmem %s2656_s0, %s2339_s17 }
  0x20   : > { %vm411_vm0 = vcmask 254976   ;;  %v413_v1 = vld [vmem:[%s2638_s3] sm:$0x3]  ;;  %v2211_v2 = vmov 0.0  }
  0x21   : > { %v410_v0 = vld [vmem:[%s2657_s2] sm:$0x3]  ;;  %414 = vst.msk [vmem:[#allocation3] sm:$0x3] %vm411_vm0, %v413_v1  ;;  %415 = vst.msk [vmem:[#allocation4] sm:$0x3] %vm411_vm0, %v2211_v2 }
  0x22   : > { %412 = vst.msk [vmem:[#allocation2] sm:$0x3] %vm411_vm0, %v410_v0 }
  0x23 PF: > { %v2065_v3 = vld [vmem:[%s2640_s5 + $0x8] sm:$0xff]   ;;  %v2212_v4 = vmov 0.0   ;;  %v2067_v6 = vld [vmem:[%s2640_s5] sm:$0xff]   ;;  %vm2213_vm1 = vmmov 0   ;;  %vm444_vm2 = vcmask 261120   ;;  %v2070_v12 = vld [vmem:[%s2640_s5 + $0x18] sm:$0xff]  }
  0x24   : > { %1871 = vmatprep.subr.bf16.mxu0 %v2212_v4  ;;  %1879 = vmatprep.subr.bf16.mxu1 %v2212_v4  ;;  %v2066_v5 = vld [vmem:[%s2639_s4 + $0x8] sm:$0xff]   ;;  %v2068_v7 = vld [vmem:[%s2639_s4] sm:$0xff]   ;;  %v2072_v15 = vld [vmem:[%s2640_s5 + $0x10] sm:$0xff]   ;;  %vm1176_vm3 = vcmask 254976   ;;  %s2658_s1 = sld [smem:[#allocation13_spill]]  ;;  %vm1361_vm4 = vcmask 57344  }
  0x25   : > { %1872 = vmatpush3.bf16.msra.mxu0 %v2065_v3  ;;  %1875 = vmatprep.mubr.msk.bf16.mxu0 %vm2213_vm1, %v2212_v4  ;;  %v2375_v10 = vld [vmem:[%s404_s20] sm:$0x1]  ;;  %v2069_v11 = vld [vmem:[%s2641_s6 + $0x8] sm:$0xff]   ;;  %v2073_v17 = vld [vmem:[%s2639_s4 + $0x18] sm:$0xff]   ;;  %vm1390_vm5 = vcmask 1043456   ;;  %vm1386_vm6 = vcmask 64512  }
  0x26   : > { %1880 = vmatpush3.bf16.msra.mxu1 %v2066_v5  ;;  %1873 = vmatprep.subr.bf16.mxu0 %v2212_v4  ;;  %v2071_v13 = vld [vmem:[%s2641_s6] sm:$0xff]   ;;  %v2074_v18 = vld [vmem:[%s2641_s6 + $0x18] sm:$0xff]   ;;  %v2075_v19 = vld [vmem:[%s2639_s4 + $0x10] sm:$0xff]   ;;  %vm1545_vm7 = vcmask 1041409   ;;  %p1811_p12 = scmp.ne.s32.totalorder %s2303_s25, 5 }
  0x27   : > { %1881 = vmatprep.subr.bf16.mxu1 %v2212_v4  ;;  %1883 = vmatprep.mubr.msk.bf16.mxu1 %vm2213_vm1, %v2212_v4  ;;  %v2076_v20 = vld [vmem:[%s2641_s6 + $0x10] sm:$0xff]   ;;  %v2077_v21 = vld [vmem:[%s2640_s5 + $0x28] sm:$0xff]   ;;  %v2079_v23 = vld [vmem:[%s2640_s5 + $0x20] sm:$0xff]  }
  0x28   : > { %v418_v8 = vld [vmem:[#allocation4] sm:$0x3]  ;;  %v2078_v22 = vld [vmem:[%s2639_s4 + $0x28] sm:$0xff]   ;;  %v2082_v26 = vld [vmem:[%s2640_s5 + $0x38] sm:$0xff]  }
  0x29   : > { %v2373_v9 = vpack.c.bf16 %v418_v8, %v418_v8  ;;  %1874 = vmatpush3.bf16.msra.mxu0 %v2067_v6  ;;  %v417_v14 = vld [vmem:[#allocation2] sm:$0x3]  ;;  %v2081_v25 = vld [vmem:[%s2641_s6 + $0x28] sm:$0xff]   ;;  %v2084_v28 = vld [vmem:[%s2640_s5 + $0x30] sm:$0xff]  }
  0x2a   : > { %1882 = vmatpush3.bf16.msra.mxu1 %v2068_v7  ;;  %1887 = vmatprep.subr.bf16.mxu0 %v2212_v4  ;;  %v2401_v16 = vpack.c.bf16 %v417_v14, %v417_v14  ;;  %v2080_v24 = vld [vmem:[%s2639_s4 + $0x20] sm:$0xff]   ;;  %v2085_v29 = vld [vmem:[%s2639_s4 + $0x38] sm:$0xff]   ;;  %v2087_v31 = vld [vmem:[%s2639_s4 + $0x30] sm:$0xff]  }
  0x2b   : > { %1895 = vmatprep.subr.bf16.mxu1 %v2212_v4  ;;  %v2083_v27 = vld [vmem:[%s2641_s6 + $0x20] sm:$0xff]   ;;  %v2086_v30 = vld [vmem:[%s2641_s6 + $0x38] sm:$0xff]   ;;  %v2088_v32 = vld [vmem:[%s2641_s6 + $0x30] sm:$0xff]  }
  0x2c   : > { %1876 = vmatmul.mubr.msk.bf16.vlgmr.msra.gmra.mxu0 %vm444_vm2, %v2373_v9  ;;  %v2089_v33 = vld [vmem:[%s2643_s8 + $0x8] sm:$0xff]   ;;  %v2090_v34 = vld [vmem:[%s2643_s8] sm:$0xff]  }
  0x2d   : > { %1884 = vmatmul.mubr.msk.bf16.vlgmr.msra.gmra.mxu1 %vm444_vm2, %v2375_v10  ;;  %1888 = vmatpush3.bf16.msra.mxu0 %v2069_v11  ;;  %v1724_v46 = vld [vmem:[%s2642_s7] ss:$0 sm:$0xff]  ;;  %v1748_v59 = vld [vmem:[%s2642_s7 + $0x1] ss:$0 sm:$0xff] }
  0x2e   : > { %1896 = vmatpush3.bf16.msra.mxu1 %v2070_v12  ;;  %1889 = vmatprep.subr.bf16.mxu0 %v2212_v4 }
  0x2f   : > { %1897 = vmatprep.subr.bf16.mxu1 %v2212_v4  ;;  %1891 = vmatprep.mubr.msk.bf16.mxu0 %vm2213_vm1, %v2212_v4 }
  0x30   : > { %1899 = vmatprep.mubr.msk.bf16.mxu1 %vm2213_vm1, %v2212_v4 }
  0x31   : > { %1890 = vmatpush3.bf16.msra.mxu0 %v2071_v13 }
  0x32   : > { %1898 = vmatpush3.bf16.msra.mxu1 %v2072_v15  ;;  %1903 = vmatprep.subr.bf16.mxu0 %v2212_v4 }
  0x33   : > { %1911 = vmatprep.subr.bf16.mxu1 %v2212_v4 }
  0x34   : > { %1892 = vmatmul.mubr.msk.bf16.vlgmr.msra.gmra.mxu0 %vm444_vm2, %v2401_v16 }
  0x35   : > { %1900 = vmatmul.mubr.msk.bf16.vlgmr.msra.gmra.mxu1 %vm444_vm2, %v2373_v9  ;;  %1904 = vmatpush3.bf16.msra.mxu0 %v2073_v17 }
  0x36   : > { %1912 = vmatpush3.bf16.msra.mxu1 %v2074_v18  ;;  %1905 = vmatprep.subr.bf16.mxu0 %v2212_v4 }
  0x37   : > { %1913 = vmatprep.subr.bf16.mxu1 %v2212_v4  ;;  %1907 = vmatprep.mubr.msk.bf16.mxu0 %vm2213_vm1, %v2212_v4 }
  0x38   : > { %1915 = vmatprep.mubr.msk.bf16.mxu1 %vm2213_vm1, %v2212_v4 }
  0x39   : > { %1906 = vmatpush3.bf16.msra.mxu0 %v2075_v19 }
  0x3a   : > { %1914 = vmatpush3.bf16.msra.mxu1 %v2076_v20  ;;  %1919 = vmatprep.subr.bf16.mxu0 %v2212_v4 }
  0x3b   : > { %1927 = vmatprep.subr.bf16.mxu1 %v2212_v4 }
  0x3c   : > { %1908 = vmatmul.mubr.msk.bf16.vlgmr.msra.gmra.mxu0 %vm444_vm2, %v2375_v10 }
  0x3d   : > { %1916 = vmatmul.mubr.msk.bf16.vlgmr.msra.gmra.mxu1 %vm444_vm2, %v2401_v16  ;;  %1920 = vmatpush3.bf16.msra.mxu0 %v2077_v21 }
  0x3e   : > { %1928 = vmatpush3.bf16.msra.mxu1 %v2078_v22  ;;  %1921 = vmatprep.subr.bf16.mxu0 %v2212_v4 }
  0x3f   : > { %1929 = vmatprep.subr.bf16.mxu1 %v2212_v4  ;;  %1923 = vmatprep.mubr.msk.bf16.mxu0 %vm2213_vm1, %v2212_v4 }
  0x40   : > { %1931 = vmatprep.mubr.msk.bf16.mxu1 %vm2213_vm1, %v2212_v4 }
  0x41   : > { %1922 = vmatpush3.bf16.msra.mxu0 %v2079_v23 }
  0x42   : > { %1930 = vmatpush3.bf16.msra.mxu1 %v2080_v24  ;;  %1935 = vmatprep.subr.bf16.mxu0 %v2212_v4 }
  0x43   : > { %1943 = vmatprep.subr.bf16.mxu1 %v2212_v4 }
  0x44   : > { %1924 = vmatmul.mubr.msk.bf16.vlgmr.msra.gmra.mxu0 %vm444_vm2, %v2373_v9 }
  0x45   : > { %1932 = vmatmul.mubr.msk.bf16.vlgmr.msra.gmra.mxu1 %vm444_vm2, %v2375_v10  ;;  %1936 = vmatpush3.bf16.msra.mxu0 %v2081_v25 }
  0x46   : > { %1944 = vmatpush3.bf16.msra.mxu1 %v2082_v26  ;;  %1937 = vmatprep.subr.bf16.mxu0 %v2212_v4 }
  0x47   : > { %1945 = vmatprep.subr.bf16.mxu1 %v2212_v4  ;;  %1939 = vmatprep.mubr.msk.bf16.mxu0 %vm2213_vm1, %v2212_v4 }
  0x48   : > { %1947 = vmatprep.mubr.msk.bf16.mxu1 %vm2213_vm1, %v2212_v4 }
  0x49   : > { %1938 = vmatpush3.bf16.msra.mxu0 %v2083_v27 }
  0x4a   : > { %1946 = vmatpush3.bf16.msra.mxu1 %v2084_v28  ;;  %1951 = vmatprep.subr.bf16.mxu0 %v2212_v4 }
  0x4b   : > { %1959 = vmatprep.subr.bf16.mxu1 %v2212_v4 }
  0x4c   : > { %1940 = vmatmul.mubr.msk.bf16.vlgmr.msra.gmra.mxu0 %vm444_vm2, %v2401_v16 }
  0x4d   : > { %1948 = vmatmul.mubr.msk.bf16.vlgmr.msra.gmra.mxu1 %vm444_vm2, %v2373_v9  ;;  %1952 = vmatpush3.bf16.msra.mxu0 %v2085_v29 }
  0x4e   : > { %1960 = vmatpush3.bf16.msra.mxu1 %v2086_v30  ;;  %1953 = vmatprep.subr.bf16.mxu0 %v2212_v4 }
  0x4f   : > { %1961 = vmatprep.subr.bf16.mxu1 %v2212_v4  ;;  %1955 = vmatprep.mubr.msk.bf16.mxu0 %vm2213_vm1, %v2212_v4 }
  0x50   : > { %1963 = vmatprep.mubr.msk.bf16.mxu1 %vm2213_vm1, %v2212_v4 }
  0x51   : > { %1954 = vmatpush3.bf16.msra.mxu0 %v2087_v31 }
  0x52   : > { %1962 = vmatpush3.bf16.msra.mxu1 %v2088_v32  ;;  %1967 = vmatprep.subr.bf16.mxu0 %v2212_v4 }
  0x53   : > { %1975 = vmatprep.subr.bf16.mxu1 %v2212_v4 }
  0x54   : > { %1956 = vmatmul.mubr.msk.bf16.vlgmr.msra.gmra.mxu0 %vm444_vm2, %v2375_v10 }
  0x55   : > { %1964 = vmatmul.mubr.msk.bf16.vlgmr.msra.gmra.mxu1 %vm444_vm2, %v2401_v16  ;;  %1971 = vmatprep.mubr.msk.bf16.mxu0 %vm2213_vm1, %v2212_v4  ;;  %v1772_v16 = vld [vmem:[%s2642_s7 + $0x2] ss:$0 sm:$0xff] }
  0x56   : > { %1977 = vmatprep.mubr.msk.bf16.mxu1 %vm2213_vm1, %v2212_v4  ;;  %1968 = vmatpush3.bf16.msra.mxu0 %v2089_v33  ;;  %v1795_v33 = vld [vmem:[%s2642_s7 + $0x3] ss:$0 sm:$0xff] }
  0x57   : > { %1969 = vmatprep.subr.bf16.mxu0 %v2212_v4 }
  0x5a   : > { %1970 = vmatpush3.bf16.msra.mxu0 %v2090_v34 }
  0x5b   : > { %1981 = vmatprep.subr.bf16.mxu0 %v2212_v4 }
  0xec   : > { %v482_v35 = vpop.f32.mrf.mxu0 }
  0xed   : > { %v537_v36 = vpop.f32.mrf.mxu1 }
  0xee   : > { %v1877_v37 = vpop.f32.mrf.mxu0  ;;  %v538_v42 = vadd.f32 %v537_v36, %v482_v35 }
  0xef   : > { %v1885_v38 = vpop.f32.mrf.mxu1 }
  0xf0   : > { %v485_v39 = vpop.f32.mrf.mxu0 }
  0xf1   : > { %v540_v40 = vpop.f32.mrf.mxu1 }
  0xf2   : > { %v1878_v41 = vpop.f32.mrf.mxu0 }
  0xf3   : > { %v1886_v43 = vpop.f32.mrf.mxu1 }
  0xf4   : > { %v593_v44 = vpop.f32.mrf.mxu0 }
  0xf5   : > { %v599_v45 = vadd.f32 %v593_v44, %v538_v42  ;;  %v675_v47 = vpop.f32.mrf.mxu1  ;;  %v1170_v44 = vld [vmem:[#allocation3] sm:$0x3] }
  0xf6   : > { %v1893_v48 = vpop.f32.mrf.mxu0 }
  0xf7   : > { %v1901_v49 = vpop.f32.mrf.mxu1  ;;  %v607_v50 = vadd.f32 %v1724_v46, %v599_v45 }
  0xf8   : > { %v596_v51 = vpop.f32.mrf.mxu0 }
  0xf9   : > { %v678_v52 = vpop.f32.mrf.mxu1  ;;  %v1725_v55 = vmul.f32 -1.442695, %v607_v50 }
  0xfa   : > { %v1894_v53 = vpop.f32.mrf.mxu0 }
  0xfb   : > { %v1902_v54 = vpop.f32.mrf.mxu1  ;;  %2095 = vpow2.f32 %v1725_v55 }
  0xfc   : > { %v727_v56 = vpop.f32.mrf.mxu0 }
  0xfd   : > { %v728_v57 = vadd.f32 %v727_v56, %v675_v47  ;;  %v779_v58 = vpop.f32.mrf.mxu1  ;;  %v1179_v56 = vld [vmem:[%s2658_s1] sm:$0xf] }
  0xfe   : > { %v1909_v60 = vpop.f32.mrf.mxu0 }
  0xff   : > { %v785_v61 = vadd.f32 %v779_v58, %v728_v57  ;;  %v1917_v62 = vpop.f32.mrf.mxu1  ;;  %v1268_v57 = vsel %vm444_vm2, %v1179_v56, 0  ;;  %v1180_v58 = vld [vmem:[%s2658_s1 + $0x4] sm:$0xf]  ;;  %v2214_v60 = vmov 1966171168  }
 0x100   : > { %v730_v63 = vpop.f32.mrf.mxu0  ;;  %1976 = vmatpush3.bf16.xpose.msra.mxu1 %v1268_v57  ;;  %v1246_v62 = vlaneseq }
 0x101   : > { %v794_v0 = vadd.f32 %v1748_v59, %v785_v61  ;;  %v782_v1 = vpop.f32.mrf.mxu1  ;;  %v1319_v59 = vsel %vm444_vm2, %v1180_v58, 0  ;;  %1987 = vmatprep.subr.bf16.mxu1 %v2212_v4  ;;  %v1244_v61 = vunpack.c.l.s4 %v2214_v60 }
 0x102   : > { %v1910_v2 = vpop.f32.mrf.mxu0 }
 0x103   : > { %v1749_v3 = vmul.f32 -1.442695, %v794_v0  ;;  %v1918_v5 = vpop.f32.mrf.mxu1  ;;  %v1245_v63 = vunpack.c.0.s8 %v1244_v61  ;;  %v1247_v0 = vshrl.u32 %v1246_v62, 7 }
 0x104   : > { %v862_v6 = vpop.f32.mrf.mxu0 }
 0x105   : > { %2097 = vpow2.f32 %v1749_v3  ;;  %v914_v7 = vpop.f32.mrf.mxu1  ;;  %v1248_v1 = vsub.s32 %v1245_v63, %v1247_v0 }
 0x106   : > { %v1925_v8 = vpop.f32.mrf.mxu0  ;;  %v915_v13 = vadd.f32 %v914_v7, %v862_v6 }
 0x107   : > { %v1933_v9 = vpop.f32.mrf.mxu1 }
 0x108   : > { %v865_v10 = vpop.f32.mrf.mxu0  ;;  %v2096_v17 = vpop.eup %2095  ;;  %v1262_v9 = vsub.s32 0, %v1247_v0 }
 0x109   : > { %v917_v11 = vpop.f32.mrf.mxu1  ;;  %v611_v23 = vadd.f32 1.0, %v2096_v17 }
 0x10a   : > { %v1926_v12 = vpop.f32.mrf.mxu0 }
 0x10b   : > { %v1934_v14 = vpop.f32.mrf.mxu1 }
 0x10c   : > { %v966_v15 = vpop.f32.mrf.mxu0 }
 0x10d   : > { %v972_v18 = vadd.f32 %v966_v15, %v915_v13  ;;  %v1044_v19 = vpop.f32.mrf.mxu1 }
 0x10e   : > { %v1941_v20 = vpop.f32.mrf.mxu0 }
 0x10f   : > { %v981_v21 = vadd.f32 %v1772_v16, %v972_v18  ;;  %v1949_v22 = vpop.f32.mrf.mxu1 }
 0x110   : > { %v969_v24 = vpop.f32.mrf.mxu0 }
 0x111   : > { %v1047_v25 = vpop.f32.mrf.mxu1  ;;  %2099 = vtanh.f32 %v981_v21 }
 0x112   : > { %v2098_v26 = vpop.eup %2097  ;;  %v1942_v27 = vpop.f32.mrf.mxu0  ;;  %2101 = vrcp.f32 %v611_v23 }
 0x113   : > { %v798_v28 = vadd.f32 1.0, %v2098_v26  ;;  %v1950_v29 = vpop.f32.mrf.mxu1 }
 0x114   : > { %v1096_v30 = vpop.f32.mrf.mxu0 }
 0x115   : > { %2103 = vrcp.f32 %v798_v28  ;;  %v1097_v31 = vadd.f32 %v1096_v30, %v1044_v19  ;;  %v1148_v32 = vpop.f32.mrf.mxu1 }
 0x116   : > { %v1957_v34 = vpop.f32.mrf.mxu0 }
 0x117   : > { %v1154_v35 = vadd.f32 %v1148_v32, %v1097_v31  ;;  %v1965_v36 = vpop.f32.mrf.mxu1 }
 0x118   : > { %v1099_v37 = vpop.f32.mrf.mxu0  ;;  %v1436_v36 = vsel %vm1390_vm5, %v1180_v58, 0 }
 0x119   : > { %v1163_v38 = vadd.f32 %v1795_v33, %v1154_v35  ;;  %v1151_v39 = vpop.f32.mrf.mxu1  ;;  %v1391_v37 = vsel %vm1390_vm5, %v1179_v56, 0 }
 0x11a   : > { %v1958_v40 = vpop.f32.mrf.mxu0 }
 0x11b   : > { %v1796_v41 = vmul.f32 -1.442695, %v1163_v38  ;;  %v1966_v42 = vpop.f32.mrf.mxu1 }
 0x11d   : > { %2105 = vpow2.f32 %v1796_v41 }
 0x11e   : > { %v2100_v43 = vpop.eup %2099 }
 0x11f   : > { %v2102_v45 = vpop.eup %2101 }
 0x120   : > { %v1172_v48 = vmul.f32 %v2102_v45, %v2100_v43  ;;  %v2091_v45 = vld [vmem:[%s2645_s10 + $0x8] sm:$0xff]  }
 0x122   : > { %v2104_v46 = vpop.eup %2103 }
 0x123   : > { %v1171_v47 = vmul.f32 %v2104_v46, %v1170_v44 }
 0x125   : > { %v1173_v49 = vadd.f32 %v1172_v48, %v1171_v47  ;;  %v2092_v47 = vld [vmem:[%s2645_s10] sm:$0xff]   ;;  %v2093_v48 = vld [vmem:[%s2644_s9 + $0x8] sm:$0xff]  }
 0x127   : > { %1177 = vst.msk [vmem:[#allocation3] sm:$0x3] %vm1176_vm3, %v1173_v49  ;;  %2107 = vtanh.f32 %v1173_v49  ;;  %v2094_v49 = vld [vmem:[%s2644_s9] sm:$0xff]  }
 0x12a   : > { %v2106_v50 = vpop.eup %2105 }
 0x12b   : > { %v1167_v51 = vadd.f32 1.0, %v2106_v50 }
 0x12d   : > { %2109 = vrcp.f32 %v1167_v51 }
 0x134   : > { %v2108_v52 = vpop.eup %2107 }
 0x13a   : > { %v2110_v53 = vpop.eup %2109 }
 0x13b   : > { %v1175_v54 = vmul.f32 %v2110_v53, %v2108_v52 }
 0x13d   : > { %1178 = vst.msk [vmem:[#allocation2] sm:$0x3] %vm1176_vm3, %v1175_v54  ;;  %v2531_v55 = vpack.c.bf16 %v1175_v54, %v1175_v54 }
 0x13f   : > { %1972 = vmatmul.mubr.msk.bf16.vlgmr.msra.gmra.mxu0 %vm444_vm2, %v2531_v55 }
 0x140   : > { %1983 = vmatprep.mubr.msk.bf16.mxu0 %vm2213_vm1, %v2212_v4  ;;  %1982 = vmatpush3.bf16.xpose.msra.mxu0 %v1319_v59 }
 0x141   : > { %1993 = vmatprep.subr.bf16.mxu0 %v2212_v4 }
 0x1ff   : > { %v1235_v2 = vpop.f32.mrf.mxu0 }
 0x200   : > { %v1241_v3 = vpack.c.bf16 %v1235_v2, %v1235_v2 }
 0x201   : > { %v1973_v5 = vpop.f32.mrf.mxu0 }
 0x202   : > { %v1249_v6 = vrot.slane %v1241_v3, %v1248_v1 }
 0x203   : > { %v1238_v7 = vpop.f32.mrf.mxu0 }
 0x204   : > { %v1256_v8 = vrot.slane %v1249_v6, %v1248_v1 }
 0x205   : > { %v1974_v10 = vpop.f32.mrf.mxu0 }
 0x206   : > { %v1258_v11 = vunpack.i.h.s16 %v1256_v8  ;;  %v1800_v12 = vpack.i.b16 %v1256_v8, %v1256_v8 }
 0x208   : > { %v1263_v13 = vrot.slane %v1800_v12, %v1262_v9  ;;  %v1310_v14 = vpack.i.b16 %v1258_v11, %v1258_v11 }
 0x20a   : > { %v1314_v15 = vrot.slane %v1310_v14, %v1262_v9  ;;  %1978 = vmatmul.mubr.msk.bf16.vlgmr.msra.gmra.mxu1 %vm444_vm2, %v1263_v13 }
 0x20b   : > { %1989 = vmatprep.mubr.msk.bf16.mxu1 %vm2213_vm1, %v2212_v4  ;;  %1988 = vmatpush3.bf16.msra.mxu1 %v1391_v37 }
 0x20c   : > { %1984 = vmatmul.mubr.msk.bf16.vlgmr.msra.gmra.mxu0 %vm444_vm2, %v1314_v15  ;;  %1999 = vmatprep.subr.bf16.mxu1 %v2212_v4 }
 0x20d   : > { %1995 = vmatprep.mubr.msk.bf16.mxu0 %vm2213_vm1, %v2212_v4  ;;  %1994 = vmatpush3.bf16.msra.mxu0 %v1436_v36 }
 0x20e   : > { %2007 = vmatprep.subr.bf16.mxu0 %v2212_v4 }
 0x2ca   : > { %v1304_v16 = vpop.f32.mrf.mxu1 }
 0x2cb   : > { %v1362_v24 = vsel %vm1361_vm4, %v1304_v16, -inf }
 0x2cc   : > { %v1979_v17 = vpop.f32.mrf.mxu1  ;;  %v1355_v18 = vpop.f32.mrf.mxu0 }
 0x2cd   : > { %v1365_v19 = vsel %vm1361_vm4, %v1355_v18, -inf }
 0x2ce   : > { %1366 = vmax.xlane.f32.xlu0 %v1365_v19  ;;  %v1307_v20 = vpop.f32.mrf.mxu1  ;;  %v1985_v21 = vpop.f32.mrf.mxu0 }
 0x2d0   : > { %v1980_v22 = vpop.f32.mrf.mxu1  ;;  %v1358_v23 = vpop.f32.mrf.mxu0 }
 0x2d2   : > { %v1986_v25 = vpop.f32.mrf.mxu0  ;;  %1363 = vmax.xlane.f32.xlu0 %v1362_v24 }
 0x357   : > { %v1367_v26 = vpop.xlane.xlu0 %1366 }
 0x358   : > { %v1369_v27 = vsub.f32 %v1355_v18, %v1367_v26 }
 0x35a   : > { %v1372_v28 = vmul.f32 1.442695, %v1369_v27 }
 0x35b   : > { %v1364_v29 = vpop.xlane.xlu0 %1363 }
 0x35c   : > { %2111 = vpow2.f32 %v1372_v28  ;;  %v1368_v30 = vsub.f32 %v1304_v16, %v1364_v29 }
 0x35e   : > { %v1370_v31 = vmul.f32 1.442695, %v1368_v30 }
 0x360   : > { %2113 = vpow2.f32 %v1370_v31 }
 0x369   : > { %v2112_v32 = vpop.eup %2111 }
 0x36a   : > { %v1377_v33 = vsel %vm1361_vm4, %v2112_v32, 0.0 }
 0x36b   : > { %1378 = vadd.xlane.f32.xlu1 %v1377_v33 }
 0x36d   : > { %v2114_v34 = vpop.eup %2113 }
 0x36e   : > { %v1374_v35 = vsel %vm1361_vm4, %v2114_v34, 0.0 }
 0x36f   : > { %1375 = vadd.xlane.f32.xlu1 %v1374_v35 }
 0x3f4   : > { %v1379_v38 = vpop.xlane.xlu1 %1378 }
 0x3f5   : > { %2115 = vrcp.f32 %v1379_v38 }
 0x3f8   : > { %v1376_v39 = vpop.xlane.xlu1 %1375 }
 0x3f9   : > { %2117 = vrcp.f32 %v1376_v39 }
 0x402   : > { %v2116_v40 = vpop.eup %2115 }
 0x403   : > { %v1383_v41 = vmul.f32 %v2116_v40, %v2112_v32 }
 0x405   : > { %v1385_v42 = vpack.c.bf16 %v1383_v41, %v1383_v41 }
 0x406   : > { %v2118_v43 = vpop.eup %2117 }
 0x407   : > { %1996 = vmatmul.mubr.msk.bf16.vlgmr.msra.gmra.mxu0 %vm1386_vm6, %v1385_v42  ;;  %v1382_v44 = vmul.f32 %v2118_v43, %v2114_v34 }
 0x408   : > { %2011 = vmatprep.mubr.msk.bf16.mxu0 %vm2213_vm1, %v2212_v4  ;;  %2008 = vmatpush3.bf16.msra.mxu0 %v2093_v48 }
 0x409   : > { %v1384_v46 = vpack.c.bf16 %v1382_v44, %v1382_v44  ;;  %2009 = vmatprep.subr.bf16.mxu0 %v2212_v4 }
 0x40b   : > { %1990 = vmatmul.mubr.msk.bf16.vlgmr.msra.gmra.mxu1 %vm1386_vm6, %v1384_v46 }
 0x40c   : > { %2000 = vmatpush3.bf16.msra.mxu1 %v2091_v45  ;;  %2003 = vmatprep.mubr.msk.bf16.mxu1 %vm2213_vm1, %v2212_v4 }
 0x40d   : > { %2001 = vmatprep.subr.bf16.mxu1 %v2212_v4  ;;  %2010 = vmatpush3.bf16.msra.mxu0 %v2094_v49 }
 0x410   : > { %2002 = vmatpush3.bf16.msra.mxu1 %v2092_v47 }
 0x413   : > { %2004 = vmatmul.mubr.msk.bf16.vlgmr.msra.gmra.mxu1 %vm444_vm2, %v2531_v55 }
 0x4c7   : > { %v1472_v50 = vpop.f32.mrf.mxu0 }
 0x4c8   : > { %v1487_v51 = vpack.c.bf16 %v1472_v50, %v1472_v50 }
 0x4c9   : > { %v1997_v52 = vpop.f32.mrf.mxu0 }
 0x4ca   : > { %v1543_v53 = vunpack.c.l.b16 %v1487_v51 }
 0x4cb   : > { %v1427_v54 = vpop.f32.mrf.mxu1  ;;  %v1475_v56 = vpop.f32.mrf.mxu0 }
 0x4cc   : > { %v1486_v57 = vpack.c.bf16 %v1427_v54, %v1427_v54  ;;  %v1544_v59 = vrot.slane %v1543_v53, 7 }
 0x4cd   : > { %v1991_v55 = vpop.f32.mrf.mxu1  ;;  %v1998_v58 = vpop.f32.mrf.mxu0 }
 0x4ce   : > { %v1542_v60 = vunpack.c.l.b16 %v1486_v57 }
 0x4cf   : > { %v1430_v61 = vpop.f32.mrf.mxu1 }
 0x4d0   : > { %v1546_v4 = vsel %vm1545_vm7, %v1544_v59, %v1542_v60 }
 0x4d1   : > { %v1547_v62 = vpack.c.b16 %v1546_v4, %v1546_v4  ;;  %v1992_v63 = vpop.f32.mrf.mxu1 }
 0x4d3   : > { %v1534_v0 = vpop.f32.mrf.mxu1  ;;  %2012 = vmatmul.mubr.msk.bf16.vlgmr.msra.gmra.mxu0 %vm444_vm2, %v1547_v62 }
 0x4d5   : > { %v2005_v1 = vpop.f32.mrf.mxu1 }
 0x4d7   : > { %v1537_v2 = vpop.f32.mrf.mxu1 }
 0x4d9   : > { %v2006_v3 = vpop.f32.mrf.mxu1 }
 0x593   : > { %v1597_v5 = vpop.f32.mrf.mxu0 }
 0x594   : > { %v1598_v6 = vadd.f32 %v1597_v5, %v1534_v0 }
 0x595   : > { %v2013_v7 = vpop.f32.mrf.mxu0 }
 0x596   : > { %2119 = vtanh.f32 %v1598_v6 }
 0x597   : > { %v1600_v8 = vpop.f32.mrf.mxu0 }
 0x599   : > { %v2014_v9 = vpop.f32.mrf.mxu0 }
 0x5a0   : > { %1609 = sbr.rel (%p1811_p12) target bundleno = 1449 (0x5a9), region = 72 }
 0x5a3   : > { %v2120_v10 = vpop.eup %2119 }
 0x5a4   : > { %1604 = vst.msk [vmem:[#allocation4] sm:$0x3] %vm1176_vm3, %v2120_v10  ;;  %1605 = vst.msk [vmem:[%s399_s26] sm:$0x3] %vm1176_vm3, %v2120_v10 }
 0x5a5   : > { %v1612_v11 = vrot.slane %v1383_v41, 7  ;;  %vm1615_vm8 = vcmask 58368  }
 0x5a7   : > { %v1613_v12 = vsel %vm1545_vm7, %v1612_v11, %v1382_v44 }
 0x5a8   : > { %1616 = vst.msk [vmem:[#allocation7] sm:$0x3] %vm1615_vm8, %v1613_v12 }
 0x5a9 PF: > { %s1813_s17 = sshll.u32 %s2303_s25, 5  ;;  %s1631_s20 = sshll.u32 %s399_s26, 4  ;;  %s1632_s20 = int_to_ptr.vmem [resolvable:$true] %s1631_s20 }
 0x5aa   : > { %s1629_s30 = scalar_lea.hbm %s2646_s11, %s1813_s17  ;;  %s2659_s15 = sand.u32 1, %s2201_s22  }
 0x5ab   : > { %s1618_s29 = scalar_lea.sflag [#allocation6], %s2659_s15  ;;  %s2121_s18 = scalar_lea.vmem %s1632_s20, 32 }
 0x5ac   : > { %p2122_p13 = scmp.ne.s32.totalorder %s1632_s20, %s2121_s18  ;;  %s2215_s0 = smov [#allocation5]  }
 0x5ad   : > { %s2125_s1 = sshll.u32 %s2215_s0, 4  ;;  %s2126_s1 = int_to_ptr.vmem [resolvable:$false] %s2125_s1 }
 0x5ae   : > { %p2123_p0 = pnand %p2122_p13, %p2322_p5  ;;  %s2127_s2 = scalar_lea.vmem %s2126_s1, 64 }
 0x5af   : > { %p2128_p3 = scmp.lt.s32.totalorder %s1632_s20, %s2126_s1  ;;  %p2129_p4 = scmp.lt.s32.totalorder %s2127_s2, %s2121_s18 }
 0x5b0   : > { %p2124_p1 = pneg %p2123_p0 }
 0x5b1   : > { %p2130_p7 = por %p2129_p4, %p2128_p3 }
 0x5b3   : > { %p2131_p8 = pnand %p2130_p7, %p2124_p1 }
 0x5b5   : > { %2134 = shalt.err (!%p2131_p8)
}
 0x5b6   : > { %s2135_s17 = scalar_lea.hbm %s1629_s30, 32  ;;  %s2139_s19 = scalar_lea.hbm %s2646_s11, 192 }
 0x5b7   : > { %p2136_p9 = scmp.ne.s32.totalorder %s1629_s30, %s2135_s17  ;;  %p2140_p12 = scmp.lt.s32.totalorder %s1629_s30, %s2646_s11 }
 0x5b8   : > { %p2141_p13 = scmp.lt.s32.totalorder %s2139_s19, %s2135_s17 }
 0x5b9   : > { %p2137_p10 = pnand %p2136_p9, %p2322_p5 }
 0x5ba   : > { %p2142_p0 = por %p2141_p13, %p2140_p12 }
 0x5bb   : > { %p2138_p11 = pneg %p2137_p10 }
 0x5bd   : > { %p2143_p2 = pnand %p2142_p0, %p2138_p11 }
 0x5bf   : > { %2146 = shalt.err (!%p2143_p2)
}
 0x5c0   : > { %2015 = dma.vmem_to_hbm [thread:$0]  (%p2322_p5), %s1632_s20, 32, %s1629_s30, %s1618_s29  }
 0x5c1   : > { %s2216_s0 = smov [#allocation7]   ;;  %p2660_p3 = scmp.eq.s32.totalorder %s2303_s25, 5 }
 0x5c2   : > { %s1642_s1 = sshll.u32 %s2216_s0, 4  ;;  %s1643_s1 = int_to_ptr.vmem [resolvable:$true] %s1642_s1 }
 0x5c3   : > { %s2147_s2 = scalar_lea.vmem %s1643_s1, 32  ;;  %p2154_p8 = scmp.lt.s32.totalorder %s1643_s1, %s1643_s1 }
 0x5c4   : > { %p2148_p1 = scmp.ne.s32.totalorder %s1643_s1, %s2147_s2  ;;  %p2155_p9 = scmp.lt.s32.totalorder %s2147_s2, %s2147_s2 }
 0x5c6   : > { %p2149_p4 = pnand %p2148_p1, %p2660_p3  ;;  %p2156_p10 = por %p2155_p9, %p2154_p8 }
 0x5c8   : > { %p2150_p7 = pneg %p2149_p4 }
 0x5ca   : > { %p2157_p6 = pnand %p2156_p10, %p2150_p7 }
 0x5cc   : > { %2160 = shalt.err (!%p2157_p6)
}
 0x5cd   : > { %p2661_p11 = pmov %p2660_p3  ;;  %p2662_p2 = pmov %p2660_p3 }
 0x5cf   : > { %2017 = dma.vmem_to_hbm [thread:$0]  (%p2661_p11), %s1643_s1, 32, %s2647_s12, [#allocation8]  }
 0x5d0   : > { %2188 = dma.done.wait (%p2662_p2), [#allocation8], 32   ;;  %p2663_p5 = pmov %p2662_p2 }
 0x5d2   : > { %2190 = vsyncadd (%p2663_p5), [#allocation8], 4294967264 }
 0x5d3 PF: > { %p2027_p12 = scmp.ge.s32.totalorder %s2209_s24, 2  ;;  %s1658_s13 = sand.u32 1, %s2197_s21  }
 0x5d4   : > { %p2664_p13 = scmp.ne.s32.totalorder %s2655_s14, 0  ;;  %s1659_s30 = scalar_lea.sflag [#allocation6], %s1658_s13 }
 0x5d6   : > { %p2022_p6 = pnand %p2027_p12, %p2664_p13 }
 0x5d8   : > { %p2023_p0 = pneg %p2022_p6 }
 0x5da   : > { %2192 = dma.done.wait (%p2023_p0), %s1659_s30, 32  }
 0x5db   : > { %2194 = vsyncadd (%p2023_p0), %s1659_s30, 4294967264  ;;  %s2665_s20 = sld [smem:[#allocation11_spill]]  ;;  %p24_p1 = scmp.ge.s32.totalorder %s2307_s27, 8  }
 0x5dc   : > { %s2666_s21 = smov %s2201_s22  ;;  %s2667_s22 = smov %s2205_s23 }
 0x5dd   : > { %s2669_s24 = smov %s2307_s27  ;;  %26 = sbr.rel (!%p24_p1) target bundleno = 8 (0x8), region = 127 }
 0x5e1   : > { %s2668_s23 = smov %s2665_s20 }
 0x5e2   :  { %1664 = vsyncpa [#allocation6], 1 }
 0x5e3   :  { %1666 = vsyncpa [#allocation6 + $0x1], 1 }
 0x5e4   :  { %1667 = vsyncpa [#allocation8], 1 }

</bundles_post_ra>
